<compile_context>
chip_gen: v7x
topology: tpu7x:2x2x1
jax: 0.10.0
libtpu: 0.0.40
codegen_flags: <defaults>
</compile_context>

<pallas_src>
import functools
import math

import jax
import jax.numpy as jnp
from jax import lax
from jax.experimental import pallas as pl
from jax.experimental.pallas import tpu as pltpu

# ---- small config, consistent with the module's constructor arguments ----
IN_CHANNEL = 3
IMG_SIZE = 16
PATCH_SIZE = 4
EMBED_DIM = 32
DEPTH = 2            # encode_layer_depth (small for the test)
NUM_HEAD = 4
NUM_CLASSES = 2
EPS = 1e-6           # nn.RMSNorm eps
CLS_PAD = 128        # lane-dense width for the class-head output
NEG_BIG = -1e30      # padded-logit bias (exp underflows to exactly 0)


# ----------------------------- fused Pallas kernel ---------------------------

def fused_vit_kernel(patch_ref, pw_ref, pb_ref, pos_ref,
                     g1_ref, wqkv_ref, bqkv_ref, wo_ref, bo_ref,
                     g2_ref, w1_ref, b1_ref, w2_ref, b2_ref,
                     cw1_ref, cb1_ref, cw2_ref, cb2_ref, cw3_ref, cb3_ref,
                     cw4_ref, cb4_ref,
                     feat_ref, cls_ref,
                     o_scratch,
                     *, num_heads, depth):
    f32 = jnp.float32
    N, D = pos_ref.shape
    hd = D // num_heads
    scale = 1.0 / math.sqrt(hd)
    # contract the LAST dim of both operands (i.e. a @ b.T) — flash-attn pattern
    NT = (((1,), (1,)), ((), ()))

    def rms(v, gamma):
        return v * lax.rsqrt(jnp.mean(v * v, axis=-1, keepdims=True) + EPS) * gamma

    def softmax_last(s):
        s = s - jnp.max(s, axis=-1, keepdims=True)
        e = jnp.exp(s)
        # exact reciprocal: keeps the tight parity check against the reference
        return e * pl.reciprocal(jnp.sum(e, axis=-1, keepdims=True), approx=False)

    def relu6(v):
        return jnp.clip(v, 0.0, 6.0)

    # ---- patch embedding (+ positional) for this batch element --------------
    x = jnp.dot(patch_ref[0], pw_ref[...], preferred_element_type=f32)
    x = x + pb_ref[...] + pos_ref[...]                       # (N, D)

    # ---- encoder layers (fully unrolled, weights stacked on a depth axis) ---
    for l in range(depth):
        hn = rms(x, g1_ref[l])
        # fused QKV: one (N, D) @ (D, 3D) MXU pass, then static lane slices
        qkv = jnp.dot(hn, wqkv_ref[l], preferred_element_type=f32) + bqkv_ref[l]
        q = qkv[:, :D]
        k = qkv[:, D:2 * D]
        v = qkv[:, 2 * D:]

        for h0 in range(num_heads):
            sl = slice(h0 * hd, (h0 + 1) * hd)
            s = lax.dot_general(q[:, sl], k[:, sl], NT,
                                preferred_element_type=f32) * scale     # (N, N)
            p = softmax_last(s)
            # each head lands at its static lane offset -> one merged out-proj
            o_scratch[:, sl] = jnp.dot(p, v[:, sl], preferred_element_type=f32)

        attn = jnp.dot(o_scratch[...], wo_ref[l],
                       preferred_element_type=f32) + bo_ref[l]
        h1 = attn + x                                        # residual (layer input)

        # NOTE: the reference EncoderLayer applies layer_norm2 to the *layer
        # input* x (not to h1) — reproduced exactly.
        h2 = rms(x, g2_ref[l])
        m = jnp.dot(h2, w1_ref[l], preferred_element_type=f32) + b1_ref[l]
        m = jnp.dot(m, w2_ref[l], preferred_element_type=f32) + b2_ref[l]
        x = m + h1

    # ---- encode_feature: 'b n d -> b d n' emitted from the kernel -----------
    # Transpose realised as an identity NT matmul on the MXU (eye_D contracted
    # against x's lane dim) so no standalone small-shape vector transpose is
    # required; one tiny extra MXU pass per batch element.
    eye_d = jnp.eye(D, dtype=f32)
    feat_ref[0] = lax.dot_general(eye_d, x, NT, preferred_element_type=f32)  # (D, N)

    # ---- ClassificationHeadSimple (dropout p=0 -> identity) -----------------
    cm = jnp.mean(x, axis=0, keepdims=True)                  # mean over tokens (1, D)
    y = relu6(jnp.dot(cm, cw1_ref[...], preferred_element_type=f32) + cb1_ref[...])
    y = relu6(jnp.dot(y, cw2_ref[...], preferred_element_type=f32) + cb2_ref[...])
    y = relu6(jnp.dot(y, cw3_ref[...], preferred_element_type=f32) + cb3_ref[...])
    # lane-dense (128-wide) fc_out: pad weights 0, pad biases -1e30 -> exp == 0
    logits = jnp.dot(y, cw4_ref[...], preferred_element_type=f32) + cb4_ref[...]
    cls_ref[0] = softmax_last(logits)                        # (1, CLS_PAD)


# ----------------------------- wrappers --------------------------------------

def _const_spec(shape):
    nd = len(shape)
    return pl.BlockSpec(shape, lambda b, _nd=nd: (0,) * _nd)


def forward(x, params):
    """VisionTransformerMultiTask.forward (get_class=True branch)."""
    B, C, H, W = x.shape
    ps = PATCH_SIZE
    gh, gw = H // ps, W // ps
    N = gh * gw
    D = EMBED_DIM
    P = C * ps * ps

    # im2col of the stride==kernel "valid" patch-embedding conv (pure layout)
    patches = x.reshape(B, C, gh, ps, gw, ps).transpose(0, 2, 4, 1, 3, 5)
    patches = patches.reshape(B, N, P)

    sp = params["stacked"]
    cp = params["class_head"]

    weight_args = (params["patch_w"], params["patch_b"], params["pos_emb"],
                   sp["g1"], sp["wqkv"], sp["bqkv"], sp["wo"], sp["bo"],
                   sp["g2"], sp["w1"], sp["b1"], sp["w2"], sp["b2"],
                   cp["w1"], cp["b1"], cp["w2"], cp["b2"], cp["w3"], cp["b3"],
                   cp["w4p"], cp["b4p"])

    in_specs = ([pl.BlockSpec((1, N, P), lambda b: (b, 0, 0))]
                + [_const_spec(w.shape) for w in weight_args])
    out_specs = (pl.BlockSpec((1, D, N), lambda b: (b, 0, 0)),
                 pl.BlockSpec((1, 1, CLS_PAD), lambda b: (b, 0, 0)))

    kern = functools.partial(fused_vit_kernel, num_heads=NUM_HEAD, depth=DEPTH)
    feat, cls_pad = pl.pallas_call(
        kern,
        grid=(B,),
        out_shape=(jax.ShapeDtypeStruct((B, D, N), jnp.float32),
                   jax.ShapeDtypeStruct((B, 1, CLS_PAD), jnp.float32)),
        in_specs=in_specs,
        out_specs=out_specs,
        scratch_shapes=[pltpu.VMEM((N, D), jnp.float32)],
        compiler_params=pltpu.CompilerParams(
            dimension_semantics=("parallel",)),
    )(patches, *weight_args)

    encode_feature = feat                                    # (B, D, N) from kernel
    encode_feature_2d = feat.reshape(B, D, gh, gw)
    output = {"class_pred": cls_pad[:, 0, :NUM_CLASSES]}
    return output, encode_feature, encode_feature_2d


# ------------------------ deterministic parameter init -----------------------

def init_params(key):
    D = EMBED_DIM
    P = IN_CHANNEL * PATCH_SIZE * PATCH_SIZE
    N = (IMG_SIZE // PATCH_SIZE) ** 2
    keys = iter(jax.random.split(key, 128))

    def nrm(shape, scale=0.02):
        return (scale * jax.random.normal(next(keys), shape)).astype(jnp.float32)

    layers = []
    for _ in range(DEPTH):
        layers.append({
            "g1": 1.0 + nrm((1, D)),
            "wq": nrm((D, D)), "bq": nrm((1, D)),
            "wk": nrm((D, D)), "bk": nrm((1, D)),
            "wv": nrm((D, D)), "bv": nrm((1, D)),
            "wo": nrm((D, D)), "bo": nrm((1, D)),
            "g2": 1.0 + nrm((1, D)),
            "w1": nrm((D, 4 * D)), "b1": nrm((1, 4 * D)),
            "w2": nrm((4 * D, D)), "b2": nrm((1, D)),
        })

    def stack(name):
        return jnp.stack([lp[name] for lp in layers], axis=0)

    stacked = {
        "g1": stack("g1"), "g2": stack("g2"),
        # fused QKV weights/biases: (L, D, 3D) / (L, 1, 3D)
        "wqkv": jnp.stack([jnp.concatenate([lp["wq"], lp["wk"], lp["wv"]], axis=1)
                           for lp in layers], axis=0),
        "bqkv": jnp.stack([jnp.concatenate([lp["bq"], lp["bk"], lp["bv"]], axis=1)
                           for lp in layers], axis=0),
        "wo": stack("wo"), "bo": stack("bo"),
        "w1": stack("w1"), "b1": stack("b1"),
        "w2": stack("w2"), "b2": stack("b2"),
    }

    ch = {
        "w1": nrm((D, 2 * D)), "b1": nrm((1, 2 * D)),
        "w2": nrm((2 * D, D)), "b2": nrm((1, D)),
        "w3": nrm((D, D // 2)), "b3": nrm((1, D // 2)),
        "w4": nrm((D // 2, NUM_CLASSES)), "b4": nrm((1, NUM_CLASSES)),
    }
    # lane-dense padded fc_out: zero weight columns, -1e30 bias for padded classes
    ch["w4p"] = jnp.zeros((D // 2, CLS_PAD), jnp.float32).at[:, :NUM_CLASSES].set(ch["w4"])
    ch["b4p"] = jnp.full((1, CLS_PAD), NEG_BIG, jnp.float32).at[:, :NUM_CLASSES].set(ch["b4"])

    return {
        "patch_w": nrm((P, D)),                  # Conv2d(k=ps, s=ps) as matmul
        "patch_b": nrm((1, D)),
        "pos_emb": nrm((N, D), scale=1.0),       # nn.Embedding weight
        "layers": layers,                        # per-layer (used by reference)
        "stacked": stacked,                      # depth-stacked (used by kernel)
        "class_head": ch,
    }


# ------------------------- pure-JAX reference (check) ------------------------

def reference_forward(x, params):
    B, C, H, W = x.shape
    ps = PATCH_SIZE
    gh, gw = H // ps, W // ps
    D = EMBED_DIM
    hd = D // NUM_HEAD
    patches = x.reshape(B, C, gh, ps, gw, ps).transpose(0, 2, 4, 1, 3, 5)
    patches = patches.reshape(B, gh * gw, C * ps * ps)
    h = patches @ params["patch_w"] + params["patch_b"] + params["pos_emb"][None]
    for lp in params["layers"]:
        hn = h * jax.lax.rsqrt(jnp.mean(h * h, -1, keepdims=True) + EPS) * lp["g1"]
        q = hn @ lp["wq"] + lp["bq"]
        k = hn @ lp["wk"] + lp["bk"]
        v = hn @ lp["wv"] + lp["bv"]
        q = q.reshape(B, -1, NUM_HEAD, hd)
        k = k.reshape(B, -1, NUM_HEAD, hd)
        v = v.reshape(B, -1, NUM_HEAD, hd)
        s = jnp.einsum("bnhd,bmhd->bhnm", q, k) / math.sqrt(hd)
        a = jax.nn.softmax(s, axis=-1)
        o = jnp.einsum("bhnm,bmhd->bnhd", a, v).reshape(B, -1, D)
        attn = o @ lp["wo"] + lp["bo"]
        h1 = attn + h
        h2 = h * jax.lax.rsqrt(jnp.mean(h * h, -1, keepdims=True) + EPS) * lp["g2"]
        m = h2 @ lp["w1"] + lp["b1"]
        m = m @ lp["w2"] + lp["b2"]
        h = m + h1
    feat = jnp.transpose(h, (0, 2, 1))                       # (B, D, N)
    cm = feat.mean(-1)
    cp = params["class_head"]
    r6 = lambda v: jnp.clip(v, 0.0, 6.0)
    y = r6(cm @ cp["w1"] + cp["b1"])
    y = r6(y @ cp["w2"] + cp["b2"])
    y = r6(y @ cp["w3"] + cp["b3"])
    y = y @ cp["w4"] + cp["b4"]
    return jax.nn.softmax(y, axis=-1), feat


# ----------------------------------- main -------------------------------------

if __name__ == "__main__":
    key = jax.random.PRNGKey(0)
    kx, kp = jax.random.split(key)
    x = jax.random.normal(kx, (2, IN_CHANNEL, IMG_SIZE, IMG_SIZE), dtype=jnp.float32)
    params = init_params(kp)

    fwd = jax.jit(forward)
    out, feat, feat2d = fwd(x, params)
    out = jax.tree_util.tree_map(jax.block_until_ready, out)
    feat = jax.block_until_ready(feat)
    feat2d = jax.block_until_ready(feat2d)

    # Reference in full-f32 matmul precision: the Pallas f32 MXU path is
    # near-exact, while XLA's *default* TPU matmul precision is reduced.
    with jax.default_matmul_precision("float32"):
        ref_cls, ref_feat = reference_forward(x, params)

    gh = IMG_SIZE // PATCH_SIZE
    assert out["class_pred"].shape == (2, NUM_CLASSES)
    assert feat.shape == (2, EMBED_DIM, gh * gh)
    assert feat2d.shape == (2, EMBED_DIM, gh, gh)
    assert jnp.allclose(feat, ref_feat, rtol=5e-4, atol=1e-5), \
        float(jnp.max(jnp.abs(feat - ref_feat)))
    assert jnp.allclose(out["class_pred"], ref_cls, rtol=5e-4, atol=1e-5), \
        float(jnp.max(jnp.abs(out["class_pred"] - ref_cls)))

    print("KERNEL_OK")
</pallas_src>

<mosaic_0001>
module attributes {stable_mosaic.version = 11 : i64} {
  func.func @fused_vit_kernel(%arg0: i32, %arg1: memref<1x16x48xf32, #tpu.memory_space<vmem>>, %arg2: memref<48x32xf32, #tpu.memory_space<vmem>>, %arg3: memref<1x32xf32, #tpu.memory_space<vmem>>, %arg4: memref<16x32xf32, #tpu.memory_space<vmem>>, %arg5: memref<2x1x32xf32, #tpu.memory_space<vmem>>, %arg6: memref<2x32x96xf32, #tpu.memory_space<vmem>>, %arg7: memref<2x1x96xf32, #tpu.memory_space<vmem>>, %arg8: memref<2x32x32xf32, #tpu.memory_space<vmem>>, %arg9: memref<2x1x32xf32, #tpu.memory_space<vmem>>, %arg10: memref<2x1x32xf32, #tpu.memory_space<vmem>>, %arg11: memref<2x32x128xf32, #tpu.memory_space<vmem>>, %arg12: memref<2x1x128xf32, #tpu.memory_space<vmem>>, %arg13: memref<2x128x32xf32, #tpu.memory_space<vmem>>, %arg14: memref<2x1x32xf32, #tpu.memory_space<vmem>>, %arg15: memref<32x64xf32, #tpu.memory_space<vmem>>, %arg16: memref<1x64xf32, #tpu.memory_space<vmem>>, %arg17: memref<64x32xf32, #tpu.memory_space<vmem>>, %arg18: memref<1x32xf32, #tpu.memory_space<vmem>>, %arg19: memref<32x16xf32, #tpu.memory_space<vmem>>, %arg20: memref<1x16xf32, #tpu.memory_space<vmem>>, %arg21: memref<16x128xf32, #tpu.memory_space<vmem>>, %arg22: memref<1x128xf32, #tpu.memory_space<vmem>>, %arg23: memref<1x32x16xf32, #tpu.memory_space<vmem>>, %arg24: memref<1x1x128xf32, #tpu.memory_space<vmem>>, %arg25: memref<16x32xf32, #tpu.memory_space<vmem>>) attributes {dimension_semantics = [#tpu.dimension_semantics<parallel>], iteration_bounds = array<i64: 2>, scalar_prefetch = 0 : i64, scratch_operands = 1 : i64, tpu.core_type = #tpu.core_type<tc>, window_params = [{transform_indices = @transform_0, window_bounds = array<i64: 1, 16, 48>}, {pipeline_mode = #tpu.pipeline_mode<synchronous>, transform_indices = @transform_1, window_bounds = array<i64: 48, 32>}, {pipeline_mode = #tpu.pipeline_mode<synchronous>, transform_indices = @transform_2, window_bounds = array<i64: 1, 32>}, {pipeline_mode = #tpu.pipeline_mode<synchronous>, transform_indices = @transform_3, window_bounds = array<i64: 16, 32>}, {pipeline_mode = #tpu.pipeline_mode<synchronous>, transform_indices = @transform_4, window_bounds = array<i64: 2, 1, 32>}, {pipeline_mode = #tpu.pipeline_mode<synchronous>, transform_indices = @transform_5, window_bounds = array<i64: 2, 32, 96>}, {pipeline_mode = #tpu.pipeline_mode<synchronous>, transform_indices = @transform_6, window_bounds = array<i64: 2, 1, 96>}, {pipeline_mode = #tpu.pipeline_mode<synchronous>, transform_indices = @transform_7, window_bounds = array<i64: 2, 32, 32>}, {pipeline_mode = #tpu.pipeline_mode<synchronous>, transform_indices = @transform_8, window_bounds = array<i64: 2, 1, 32>}, {pipeline_mode = #tpu.pipeline_mode<synchronous>, transform_indices = @transform_9, window_bounds = array<i64: 2, 1, 32>}, {pipeline_mode = #tpu.pipeline_mode<synchronous>, transform_indices = @transform_10, window_bounds = array<i64: 2, 32, 128>}, {pipeline_mode = #tpu.pipeline_mode<synchronous>, transform_indices = @transform_11, window_bounds = array<i64: 2, 1, 128>}, {pipeline_mode = #tpu.pipeline_mode<synchronous>, transform_indices = @transform_12, window_bounds = array<i64: 2, 128, 32>}, {pipeline_mode = #tpu.pipeline_mode<synchronous>, transform_indices = @transform_13, window_bounds = array<i64: 2, 1, 32>}, {pipeline_mode = #tpu.pipeline_mode<synchronous>, transform_indices = @transform_14, window_bounds = array<i64: 32, 64>}, {pipeline_mode = #tpu.pipeline_mode<synchronous>, transform_indices = @transform_15, window_bounds = array<i64: 1, 64>}, {pipeline_mode = #tpu.pipeline_mode<synchronous>, transform_indices = @transform_16, window_bounds = array<i64: 64, 32>}, {pipeline_mode = #tpu.pipeline_mode<synchronous>, transform_indices = @transform_17, window_bounds = array<i64: 1, 32>}, {pipeline_mode = #tpu.pipeline_mode<synchronous>, transform_indices = @transform_18, window_bounds = array<i64: 32, 16>}, {pipeline_mode = #tpu.pipeline_mode<synchronous>, transform_indices = @transform_19, window_bounds = array<i64: 1, 16>}, {pipeline_mode = #tpu.pipeline_mode<synchronous>, transform_indices = @transform_20, window_bounds = array<i64: 16, 128>}, {pipeline_mode = #tpu.pipeline_mode<synchronous>, transform_indices = @transform_21, window_bounds = array<i64: 1, 128>}, {transform_indices = @transform_22, window_bounds = array<i64: 1, 32, 16>}, {transform_indices = @transform_23, window_bounds = array<i64: 1, 1, 128>}]} {
    %c0 = arith.constant 0 : index
    %c0_0 = arith.constant 0 : index
    %c0_1 = arith.constant 0 : index
    %0 = vector.load %arg1[%c0, %c0_0, %c0_1] : memref<1x16x48xf32, #tpu.memory_space<vmem>>, vector<1x16x48xf32>
    %1 = vector.shape_cast %0 : vector<1x16x48xf32> to vector<16x48xf32>
    %c0_2 = arith.constant 0 : index
    %c0_3 = arith.constant 0 : index
    %2 = vector.load %arg2[%c0_2, %c0_3] : memref<48x32xf32, #tpu.memory_space<vmem>>, vector<48x32xf32>
    %cst = arith.constant dense<0.000000e+00> : vector<16x32xf32>
    %3 = tpu.matmul %1, %2, %cst {dimension_numbers = #tpu.dot_dimension_numbers<[1], [0], [0], [1], [0, 0, 1, 1], [], []>} : vector<16x48xf32>, vector<48x32xf32>, vector<16x32xf32> -> vector<16x32xf32>
    %c0_4 = arith.constant 0 : index
    %c0_5 = arith.constant 0 : index
    %4 = vector.load %arg3[%c0_4, %c0_5] : memref<1x32xf32, #tpu.memory_space<vmem>>, vector<1x32xf32>
    %5 = vector.broadcast %4 : vector<1x32xf32> to vector<16x32xf32>
    %6 = arith.addf %3, %5 : vector<16x32xf32>
    %c0_6 = arith.constant 0 : index
    %c0_7 = arith.constant 0 : index
    %7 = vector.load %arg4[%c0_6, %c0_7] : memref<16x32xf32, #tpu.memory_space<vmem>>, vector<16x32xf32>
    %8 = arith.addf %6, %7 : vector<16x32xf32>
    %c0_8 = arith.constant 0 : index
    %c0_9 = arith.constant 0 : index
    %c0_10 = arith.constant 0 : index
    %9 = vector.load %arg5[%c0_8, %c0_9, %c0_10] : memref<2x1x32xf32, #tpu.memory_space<vmem>>, vector<1x1x32xf32>
    %10 = vector.shape_cast %9 : vector<1x1x32xf32> to vector<1x32xf32>
    %11 = arith.mulf %8, %8 : vector<16x32xf32>
    %cst_11 = arith.constant dense<0.000000e+00> : vector<16xf32>
    %12 = vector.multi_reduction <add>, %11, %cst_11 [1] : vector<16x32xf32> to vector<16xf32>
    %13 = vector.shape_cast %12 : vector<16xf32> to vector<16x1xf32>
    %cst_12 = arith.constant 3.200000e+01 : f32
    %14 = vector.broadcast %cst_12 : f32 to vector<16x1xf32>
    %15 = arith.divf %13, %14 : vector<16x1xf32>
    %cst_13 = arith.constant 9.99999997E-7 : f32
    %16 = vector.broadcast %cst_13 : f32 to vector<16x1xf32>
    %17 = arith.addf %15, %16 : vector<16x1xf32>
    %18 = math.rsqrt %17 : vector<16x1xf32>
    %19 = vector.broadcast %18 : vector<16x1xf32> to vector<16x32xf32>
    %20 = arith.mulf %8, %19 : vector<16x32xf32>
    %21 = vector.broadcast %10 : vector<1x32xf32> to vector<16x32xf32>
    %22 = arith.mulf %20, %21 : vector<16x32xf32>
    %c0_14 = arith.constant 0 : index
    %c0_15 = arith.constant 0 : index
    %c0_16 = arith.constant 0 : index
    %23 = vector.load %arg6[%c0_14, %c0_15, %c0_16] : memref<2x32x96xf32, #tpu.memory_space<vmem>>, vector<1x32x96xf32>
    %24 = vector.shape_cast %23 : vector<1x32x96xf32> to vector<32x96xf32>
    %cst_17 = arith.constant dense<0.000000e+00> : vector<16x96xf32>
    %25 = tpu.matmul %22, %24, %cst_17 {dimension_numbers = #tpu.dot_dimension_numbers<[1], [0], [0], [1], [0, 0, 1, 1], [], []>} : vector<16x32xf32>, vector<32x96xf32>, vector<16x96xf32> -> vector<16x96xf32>
    %c0_18 = arith.constant 0 : index
    %c0_19 = arith.constant 0 : index
    %c0_20 = arith.constant 0 : index
    %26 = vector.load %arg7[%c0_18, %c0_19, %c0_20] : memref<2x1x96xf32, #tpu.memory_space<vmem>>, vector<1x1x96xf32>
    %27 = vector.shape_cast %26 : vector<1x1x96xf32> to vector<1x96xf32>
    %28 = vector.broadcast %27 : vector<1x96xf32> to vector<16x96xf32>
    %29 = arith.addf %25, %28 : vector<16x96xf32>
    %30 = vector.extract_strided_slice %29 {offsets = [0, 0], sizes = [16, 32], strides = [1, 1]} : vector<16x96xf32> to vector<16x32xf32>
    %31 = vector.extract_strided_slice %29 {offsets = [0, 32], sizes = [16, 32], strides = [1, 1]} : vector<16x96xf32> to vector<16x32xf32>
    %32 = vector.extract_strided_slice %29 {offsets = [0, 64], sizes = [16, 32], strides = [1, 1]} : vector<16x96xf32> to vector<16x32xf32>
    %33 = vector.extract_strided_slice %30 {offsets = [0, 0], sizes = [16, 8], strides = [1, 1]} : vector<16x32xf32> to vector<16x8xf32>
    %34 = vector.extract_strided_slice %31 {offsets = [0, 0], sizes = [16, 8], strides = [1, 1]} : vector<16x32xf32> to vector<16x8xf32>
    %cst_21 = arith.constant dense<0.000000e+00> : vector<16x16xf32>
    %35 = tpu.matmul %33, %34, %cst_21 {dimension_numbers = #tpu.dot_dimension_numbers<[1], [1], [0], [0], [0, 0, 1, 0], [], []>} : vector<16x8xf32>, vector<16x8xf32>, vector<16x16xf32> -> vector<16x16xf32>
    %cst_22 = arith.constant 0.353553385 : f32
    %36 = vector.broadcast %cst_22 : f32 to vector<16x16xf32>
    %37 = arith.mulf %35, %36 : vector<16x16xf32>
    %cst_23 = arith.constant dense<0xFF800000> : vector<16xf32>
    %38 = vector.multi_reduction <maximumf>, %37, %cst_23 [1] : vector<16x16xf32> to vector<16xf32>
    %39 = vector.shape_cast %38 : vector<16xf32> to vector<16x1xf32>
    %40 = vector.broadcast %39 : vector<16x1xf32> to vector<16x16xf32>
    %41 = arith.subf %37, %40 : vector<16x16xf32>
    %42 = math.exp %41 : vector<16x16xf32>
    %cst_24 = arith.constant dense<0.000000e+00> : vector<16xf32>
    %43 = vector.multi_reduction <add>, %42, %cst_24 [1] : vector<16x16xf32> to vector<16xf32>
    %44 = vector.shape_cast %43 : vector<16xf32> to vector<16x1xf32>
    %45 = tpu.reciprocal %44 : vector<16x1xf32> -> vector<16x1xf32>
    %46 = vector.broadcast %45 : vector<16x1xf32> to vector<16x16xf32>
    %47 = arith.mulf %42, %46 : vector<16x16xf32>
    %48 = vector.extract_strided_slice %32 {offsets = [0, 0], sizes = [16, 8], strides = [1, 1]} : vector<16x32xf32> to vector<16x8xf32>
    %cst_25 = arith.constant dense<0.000000e+00> : vector<16x8xf32>
    %49 = tpu.matmul %47, %48, %cst_25 {dimension_numbers = #tpu.dot_dimension_numbers<[1], [0], [0], [1], [0, 0, 1, 1], [], []>} : vector<16x16xf32>, vector<16x8xf32>, vector<16x8xf32> -> vector<16x8xf32>
    %c0_26 = arith.constant 0 : index
    %c0_27 = arith.constant 0 : index
    %50 = vector.load %arg25[%c0_26, %c0_27] : memref<16x32xf32, #tpu.memory_space<vmem>>, vector<16x8xf32>
    tpu.vector_store %arg25[%c0_26, %c0_27], %49 {strides = array<i32>} : memref<16x32xf32, #tpu.memory_space<vmem>>, vector<16x8xf32>,
    %51 = vector.extract_strided_slice %30 {offsets = [0, 8], sizes = [16, 8], strides = [1, 1]} : vector<16x32xf32> to vector<16x8xf32>
    %52 = vector.extract_strided_slice %31 {offsets = [0, 8], sizes = [16, 8], strides = [1, 1]} : vector<16x32xf32> to vector<16x8xf32>
    %cst_28 = arith.constant dense<0.000000e+00> : vector<16x16xf32>
    %53 = tpu.matmul %51, %52, %cst_28 {dimension_numbers = #tpu.dot_dimension_numbers<[1], [1], [0], [0], [0, 0, 1, 0], [], []>} : vector<16x8xf32>, vector<16x8xf32>, vector<16x16xf32> -> vector<16x16xf32>
    %cst_29 = arith.constant 0.353553385 : f32
    %54 = vector.broadcast %cst_29 : f32 to vector<16x16xf32>
    %55 = arith.mulf %53, %54 : vector<16x16xf32>
    %cst_30 = arith.constant dense<0xFF800000> : vector<16xf32>
    %56 = vector.multi_reduction <maximumf>, %55, %cst_30 [1] : vector<16x16xf32> to vector<16xf32>
    %57 = vector.shape_cast %56 : vector<16xf32> to vector<16x1xf32>
    %58 = vector.broadcast %57 : vector<16x1xf32> to vector<16x16xf32>
    %59 = arith.subf %55, %58 : vector<16x16xf32>
    %60 = math.exp %59 : vector<16x16xf32>
    %cst_31 = arith.constant dense<0.000000e+00> : vector<16xf32>
    %61 = vector.multi_reduction <add>, %60, %cst_31 [1] : vector<16x16xf32> to vector<16xf32>
    %62 = vector.shape_cast %61 : vector<16xf32> to vector<16x1xf32>
    %63 = tpu.reciprocal %62 : vector<16x1xf32> -> vector<16x1xf32>
    %64 = vector.broadcast %63 : vector<16x1xf32> to vector<16x16xf32>
    %65 = arith.mulf %60, %64 : vector<16x16xf32>
    %66 = vector.extract_strided_slice %32 {offsets = [0, 8], sizes = [16, 8], strides = [1, 1]} : vector<16x32xf32> to vector<16x8xf32>
    %cst_32 = arith.constant dense<0.000000e+00> : vector<16x8xf32>
    %67 = tpu.matmul %65, %66, %cst_32 {dimension_numbers = #tpu.dot_dimension_numbers<[1], [0], [0], [1], [0, 0, 1, 1], [], []>} : vector<16x16xf32>, vector<16x8xf32>, vector<16x8xf32> -> vector<16x8xf32>
    %c0_33 = arith.constant 0 : index
    %c8 = arith.constant 8 : index
    %68 = vector.load %arg25[%c0_33, %c8] : memref<16x32xf32, #tpu.memory_space<vmem>>, vector<16x8xf32>
    tpu.vector_store %arg25[%c0_33, %c8], %67 {strides = array<i32>} : memref<16x32xf32, #tpu.memory_space<vmem>>, vector<16x8xf32>,
    %69 = vector.extract_strided_slice %30 {offsets = [0, 16], sizes = [16, 8], strides = [1, 1]} : vector<16x32xf32> to vector<16x8xf32>
    %70 = vector.extract_strided_slice %31 {offsets = [0, 16], sizes = [16, 8], strides = [1, 1]} : vector<16x32xf32> to vector<16x8xf32>
    %cst_34 = arith.constant dense<0.000000e+00> : vector<16x16xf32>
    %71 = tpu.matmul %69, %70, %cst_34 {dimension_numbers = #tpu.dot_dimension_numbers<[1], [1], [0], [0], [0, 0, 1, 0], [], []>} : vector<16x8xf32>, vector<16x8xf32>, vector<16x16xf32> -> vector<16x16xf32>
    %cst_35 = arith.constant 0.353553385 : f32
    %72 = vector.broadcast %cst_35 : f32 to vector<16x16xf32>
    %73 = arith.mulf %71, %72 : vector<16x16xf32>
    %cst_36 = arith.constant dense<0xFF800000> : vector<16xf32>
    %74 = vector.multi_reduction <maximumf>, %73, %cst_36 [1] : vector<16x16xf32> to vector<16xf32>
    %75 = vector.shape_cast %74 : vector<16xf32> to vector<16x1xf32>
    %76 = vector.broadcast %75 : vector<16x1xf32> to vector<16x16xf32>
    %77 = arith.subf %73, %76 : vector<16x16xf32>
    %78 = math.exp %77 : vector<16x16xf32>
    %cst_37 = arith.constant dense<0.000000e+00> : vector<16xf32>
    %79 = vector.multi_reduction <add>, %78, %cst_37 [1] : vector<16x16xf32> to vector<16xf32>
    %80 = vector.shape_cast %79 : vector<16xf32> to vector<16x1xf32>
    %81 = tpu.reciprocal %80 : vector<16x1xf32> -> vector<16x1xf32>
    %82 = vector.broadcast %81 : vector<16x1xf32> to vector<16x16xf32>
    %83 = arith.mulf %78, %82 : vector<16x16xf32>
    %84 = vector.extract_strided_slice %32 {offsets = [0, 16], sizes = [16, 8], strides = [1, 1]} : vector<16x32xf32> to vector<16x8xf32>
    %cst_38 = arith.constant dense<0.000000e+00> : vector<16x8xf32>
    %85 = tpu.matmul %83, %84, %cst_38 {dimension_numbers = #tpu.dot_dimension_numbers<[1], [0], [0], [1], [0, 0, 1, 1], [], []>} : vector<16x16xf32>, vector<16x8xf32>, vector<16x8xf32> -> vector<16x8xf32>
    %c0_39 = arith.constant 0 : index
    %c16 = arith.constant 16 : index
    %86 = vector.load %arg25[%c0_39, %c16] : memref<16x32xf32, #tpu.memory_space<vmem>>, vector<16x8xf32>
    tpu.vector_store %arg25[%c0_39, %c16], %85 {strides = array<i32>} : memref<16x32xf32, #tpu.memory_space<vmem>>, vector<16x8xf32>,
    %87 = vector.extract_strided_slice %30 {offsets = [0, 24], sizes = [16, 8], strides = [1, 1]} : vector<16x32xf32> to vector<16x8xf32>
    %88 = vector.extract_strided_slice %31 {offsets = [0, 24], sizes = [16, 8], strides = [1, 1]} : vector<16x32xf32> to vector<16x8xf32>
    %cst_40 = arith.constant dense<0.000000e+00> : vector<16x16xf32>
    %89 = tpu.matmul %87, %88, %cst_40 {dimension_numbers = #tpu.dot_dimension_numbers<[1], [1], [0], [0], [0, 0, 1, 0], [], []>} : vector<16x8xf32>, vector<16x8xf32>, vector<16x16xf32> -> vector<16x16xf32>
    %cst_41 = arith.constant 0.353553385 : f32
    %90 = vector.broadcast %cst_41 : f32 to vector<16x16xf32>
    %91 = arith.mulf %89, %90 : vector<16x16xf32>
    %cst_42 = arith.constant dense<0xFF800000> : vector<16xf32>
    %92 = vector.multi_reduction <maximumf>, %91, %cst_42 [1] : vector<16x16xf32> to vector<16xf32>
    %93 = vector.shape_cast %92 : vector<16xf32> to vector<16x1xf32>
    %94 = vector.broadcast %93 : vector<16x1xf32> to vector<16x16xf32>
    %95 = arith.subf %91, %94 : vector<16x16xf32>
    %96 = math.exp %95 : vector<16x16xf32>
    %cst_43 = arith.constant dense<0.000000e+00> : vector<16xf32>
    %97 = vector.multi_reduction <add>, %96, %cst_43 [1] : vector<16x16xf32> to vector<16xf32>
    %98 = vector.shape_cast %97 : vector<16xf32> to vector<16x1xf32>
    %99 = tpu.reciprocal %98 : vector<16x1xf32> -> vector<16x1xf32>
    %100 = vector.broadcast %99 : vector<16x1xf32> to vector<16x16xf32>
    %101 = arith.mulf %96, %100 : vector<16x16xf32>
    %102 = vector.extract_strided_slice %32 {offsets = [0, 24], sizes = [16, 8], strides = [1, 1]} : vector<16x32xf32> to vector<16x8xf32>
    %cst_44 = arith.constant dense<0.000000e+00> : vector<16x8xf32>
    %103 = tpu.matmul %101, %102, %cst_44 {dimension_numbers = #tpu.dot_dimension_numbers<[1], [0], [0], [1], [0, 0, 1, 1], [], []>} : vector<16x16xf32>, vector<16x8xf32>, vector<16x8xf32> -> vector<16x8xf32>
    %c0_45 = arith.constant 0 : index
    %c24 = arith.constant 24 : index
    %104 = vector.load %arg25[%c0_45, %c24] : memref<16x32xf32, #tpu.memory_space<vmem>>, vector<16x8xf32>
    tpu.vector_store %arg25[%c0_45, %c24], %103 {strides = array<i32>} : memref<16x32xf32, #tpu.memory_space<vmem>>, vector<16x8xf32>,
    %c0_46 = arith.constant 0 : index
    %c0_47 = arith.constant 0 : index
    %105 = vector.load %arg25[%c0_46, %c0_47] : memref<16x32xf32, #tpu.memory_space<vmem>>, vector<16x32xf32>
    %c0_48 = arith.constant 0 : index
    %c0_49 = arith.constant 0 : index
    %c0_50 = arith.constant 0 : index
    %106 = vector.load %arg8[%c0_48, %c0_49, %c0_50] : memref<2x32x32xf32, #tpu.memory_space<vmem>>, vector<1x32x32xf32>
    %107 = vector.shape_cast %106 : vector<1x32x32xf32> to vector<32x32xf32>
    %cst_51 = arith.constant dense<0.000000e+00> : vector<16x32xf32>
    %108 = tpu.matmul %105, %107, %cst_51 {dimension_numbers = #tpu.dot_dimension_numbers<[1], [0], [0], [1], [0, 0, 1, 1], [], []>} : vector<16x32xf32>, vector<32x32xf32>, vector<16x32xf32> -> vector<16x32xf32>
    %c0_52 = arith.constant 0 : index
    %c0_53 = arith.constant 0 : index
    %c0_54 = arith.constant 0 : index
    %109 = vector.load %arg9[%c0_52, %c0_53, %c0_54] : memref<2x1x32xf32, #tpu.memory_space<vmem>>, vector<1x1x32xf32>
    %110 = vector.shape_cast %109 : vector<1x1x32xf32> to vector<1x32xf32>
    %111 = vector.broadcast %110 : vector<1x32xf32> to vector<16x32xf32>
    %112 = arith.addf %108, %111 : vector<16x32xf32>
    %113 = arith.addf %112, %8 : vector<16x32xf32>
    %c0_55 = arith.constant 0 : index
    %c0_56 = arith.constant 0 : index
    %c0_57 = arith.constant 0 : index
    %114 = vector.load %arg10[%c0_55, %c0_56, %c0_57] : memref<2x1x32xf32, #tpu.memory_space<vmem>>, vector<1x1x32xf32>
    %115 = vector.shape_cast %114 : vector<1x1x32xf32> to vector<1x32xf32>
    %116 = arith.mulf %8, %8 : vector<16x32xf32>
    %cst_58 = arith.constant dense<0.000000e+00> : vector<16xf32>
    %117 = vector.multi_reduction <add>, %116, %cst_58 [1] : vector<16x32xf32> to vector<16xf32>
    %118 = vector.shape_cast %117 : vector<16xf32> to vector<16x1xf32>
    %cst_59 = arith.constant 3.200000e+01 : f32
    %119 = vector.broadcast %cst_59 : f32 to vector<16x1xf32>
    %120 = arith.divf %118, %119 : vector<16x1xf32>
    %cst_60 = arith.constant 9.99999997E-7 : f32
    %121 = vector.broadcast %cst_60 : f32 to vector<16x1xf32>
    %122 = arith.addf %120, %121 : vector<16x1xf32>
    %123 = math.rsqrt %122 : vector<16x1xf32>
    %124 = vector.broadcast %123 : vector<16x1xf32> to vector<16x32xf32>
    %125 = arith.mulf %8, %124 : vector<16x32xf32>
    %126 = vector.broadcast %115 : vector<1x32xf32> to vector<16x32xf32>
    %127 = arith.mulf %125, %126 : vector<16x32xf32>
    %c0_61 = arith.constant 0 : index
    %c0_62 = arith.constant 0 : index
    %c0_63 = arith.constant 0 : index
    %128 = vector.load %arg11[%c0_61, %c0_62, %c0_63] : memref<2x32x128xf32, #tpu.memory_space<vmem>>, vector<1x32x128xf32>
    %129 = vector.shape_cast %128 : vector<1x32x128xf32> to vector<32x128xf32>
    %cst_64 = arith.constant dense<0.000000e+00> : vector<16x128xf32>
    %130 = tpu.matmul %127, %129, %cst_64 {dimension_numbers = #tpu.dot_dimension_numbers<[1], [0], [0], [1], [0, 0, 1, 1], [], []>} : vector<16x32xf32>, vector<32x128xf32>, vector<16x128xf32> -> vector<16x128xf32>
    %c0_65 = arith.constant 0 : index
    %c0_66 = arith.constant 0 : index
    %c0_67 = arith.constant 0 : index
    %131 = vector.load %arg12[%c0_65, %c0_66, %c0_67] : memref<2x1x128xf32, #tpu.memory_space<vmem>>, vector<1x1x128xf32>
    %132 = vector.shape_cast %131 : vector<1x1x128xf32> to vector<1x128xf32>
    %133 = vector.broadcast %132 : vector<1x128xf32> to vector<16x128xf32>
    %134 = arith.addf %130, %133 : vector<16x128xf32>
    %c0_68 = arith.constant 0 : index
    %c0_69 = arith.constant 0 : index
    %c0_70 = arith.constant 0 : index
    %135 = vector.load %arg13[%c0_68, %c0_69, %c0_70] : memref<2x128x32xf32, #tpu.memory_space<vmem>>, vector<1x128x32xf32>
    %136 = vector.shape_cast %135 : vector<1x128x32xf32> to vector<128x32xf32>
    %cst_71 = arith.constant dense<0.000000e+00> : vector<16x32xf32>
    %137 = tpu.matmul %134, %136, %cst_71 {dimension_numbers = #tpu.dot_dimension_numbers<[1], [0], [0], [1], [0, 0, 1, 1], [], []>} : vector<16x128xf32>, vector<128x32xf32>, vector<16x32xf32> -> vector<16x32xf32>
    %c0_72 = arith.constant 0 : index
    %c0_73 = arith.constant 0 : index
    %c0_74 = arith.constant 0 : index
    %138 = vector.load %arg14[%c0_72, %c0_73, %c0_74] : memref<2x1x32xf32, #tpu.memory_space<vmem>>, vector<1x1x32xf32>
    %139 = vector.shape_cast %138 : vector<1x1x32xf32> to vector<1x32xf32>
    %140 = vector.broadcast %139 : vector<1x32xf32> to vector<16x32xf32>
    %141 = arith.addf %137, %140 : vector<16x32xf32>
    %142 = arith.addf %141, %113 : vector<16x32xf32>
    %c1 = arith.constant 1 : index
    %c0_75 = arith.constant 0 : index
    %c0_76 = arith.constant 0 : index
    %143 = vector.load %arg5[%c1, %c0_75, %c0_76] : memref<2x1x32xf32, #tpu.memory_space<vmem>>, vector<1x1x32xf32>
    %144 = vector.shape_cast %143 : vector<1x1x32xf32> to vector<1x32xf32>
    %145 = arith.mulf %142, %142 : vector<16x32xf32>
    %cst_77 = arith.constant dense<0.000000e+00> : vector<16xf32>
    %146 = vector.multi_reduction <add>, %145, %cst_77 [1] : vector<16x32xf32> to vector<16xf32>
    %147 = vector.shape_cast %146 : vector<16xf32> to vector<16x1xf32>
    %cst_78 = arith.constant 3.200000e+01 : f32
    %148 = vector.broadcast %cst_78 : f32 to vector<16x1xf32>
    %149 = arith.divf %147, %148 : vector<16x1xf32>
    %cst_79 = arith.constant 9.99999997E-7 : f32
    %150 = vector.broadcast %cst_79 : f32 to vector<16x1xf32>
    %151 = arith.addf %149, %150 : vector<16x1xf32>
    %152 = math.rsqrt %151 : vector<16x1xf32>
    %153 = vector.broadcast %152 : vector<16x1xf32> to vector<16x32xf32>
    %154 = arith.mulf %142, %153 : vector<16x32xf32>
    %155 = vector.broadcast %144 : vector<1x32xf32> to vector<16x32xf32>
    %156 = arith.mulf %154, %155 : vector<16x32xf32>
    %c1_80 = arith.constant 1 : index
    %c0_81 = arith.constant 0 : index
    %c0_82 = arith.constant 0 : index
    %157 = vector.load %arg6[%c1_80, %c0_81, %c0_82] : memref<2x32x96xf32, #tpu.memory_space<vmem>>, vector<1x32x96xf32>
    %158 = vector.shape_cast %157 : vector<1x32x96xf32> to vector<32x96xf32>
    %cst_83 = arith.constant dense<0.000000e+00> : vector<16x96xf32>
    %159 = tpu.matmul %156, %158, %cst_83 {dimension_numbers = #tpu.dot_dimension_numbers<[1], [0], [0], [1], [0, 0, 1, 1], [], []>} : vector<16x32xf32>, vector<32x96xf32>, vector<16x96xf32> -> vector<16x96xf32>
    %c1_84 = arith.constant 1 : index
    %c0_85 = arith.constant 0 : index
    %c0_86 = arith.constant 0 : index
    %160 = vector.load %arg7[%c1_84, %c0_85, %c0_86] : memref<2x1x96xf32, #tpu.memory_space<vmem>>, vector<1x1x96xf32>
    %161 = vector.shape_cast %160 : vector<1x1x96xf32> to vector<1x96xf32>
    %162 = vector.broadcast %161 : vector<1x96xf32> to vector<16x96xf32>
    %163 = arith.addf %159, %162 : vector<16x96xf32>
    %164 = vector.extract_strided_slice %163 {offsets = [0, 0], sizes = [16, 32], strides = [1, 1]} : vector<16x96xf32> to vector<16x32xf32>
    %165 = vector.extract_strided_slice %163 {offsets = [0, 32], sizes = [16, 32], strides = [1, 1]} : vector<16x96xf32> to vector<16x32xf32>
    %166 = vector.extract_strided_slice %163 {offsets = [0, 64], sizes = [16, 32], strides = [1, 1]} : vector<16x96xf32> to vector<16x32xf32>
    %167 = vector.extract_strided_slice %164 {offsets = [0, 0], sizes = [16, 8], strides = [1, 1]} : vector<16x32xf32> to vector<16x8xf32>
    %168 = vector.extract_strided_slice %165 {offsets = [0, 0], sizes = [16, 8], strides = [1, 1]} : vector<16x32xf32> to vector<16x8xf32>
    %cst_87 = arith.constant dense<0.000000e+00> : vector<16x16xf32>
    %169 = tpu.matmul %167, %168, %cst_87 {dimension_numbers = #tpu.dot_dimension_numbers<[1], [1], [0], [0], [0, 0, 1, 0], [], []>} : vector<16x8xf32>, vector<16x8xf32>, vector<16x16xf32> -> vector<16x16xf32>
    %cst_88 = arith.constant 0.353553385 : f32
    %170 = vector.broadcast %cst_88 : f32 to vector<16x16xf32>
    %171 = arith.mulf %169, %170 : vector<16x16xf32>
    %cst_89 = arith.constant dense<0xFF800000> : vector<16xf32>
    %172 = vector.multi_reduction <maximumf>, %171, %cst_89 [1] : vector<16x16xf32> to vector<16xf32>
    %173 = vector.shape_cast %172 : vector<16xf32> to vector<16x1xf32>
    %174 = vector.broadcast %173 : vector<16x1xf32> to vector<16x16xf32>
    %175 = arith.subf %171, %174 : vector<16x16xf32>
    %176 = math.exp %175 : vector<16x16xf32>
    %cst_90 = arith.constant dense<0.000000e+00> : vector<16xf32>
    %177 = vector.multi_reduction <add>, %176, %cst_90 [1] : vector<16x16xf32> to vector<16xf32>
    %178 = vector.shape_cast %177 : vector<16xf32> to vector<16x1xf32>
    %179 = tpu.reciprocal %178 : vector<16x1xf32> -> vector<16x1xf32>
    %180 = vector.broadcast %179 : vector<16x1xf32> to vector<16x16xf32>
    %181 = arith.mulf %176, %180 : vector<16x16xf32>
    %182 = vector.extract_strided_slice %166 {offsets = [0, 0], sizes = [16, 8], strides = [1, 1]} : vector<16x32xf32> to vector<16x8xf32>
    %cst_91 = arith.constant dense<0.000000e+00> : vector<16x8xf32>
    %183 = tpu.matmul %181, %182, %cst_91 {dimension_numbers = #tpu.dot_dimension_numbers<[1], [0], [0], [1], [0, 0, 1, 1], [], []>} : vector<16x16xf32>, vector<16x8xf32>, vector<16x8xf32> -> vector<16x8xf32>
    %c0_92 = arith.constant 0 : index
    %c0_93 = arith.constant 0 : index
    %184 = vector.load %arg25[%c0_92, %c0_93] : memref<16x32xf32, #tpu.memory_space<vmem>>, vector<16x8xf32>
    tpu.vector_store %arg25[%c0_92, %c0_93], %183 {strides = array<i32>} : memref<16x32xf32, #tpu.memory_space<vmem>>, vector<16x8xf32>,
    %185 = vector.extract_strided_slice %164 {offsets = [0, 8], sizes = [16, 8], strides = [1, 1]} : vector<16x32xf32> to vector<16x8xf32>
    %186 = vector.extract_strided_slice %165 {offsets = [0, 8], sizes = [16, 8], strides = [1, 1]} : vector<16x32xf32> to vector<16x8xf32>
    %cst_94 = arith.constant dense<0.000000e+00> : vector<16x16xf32>
    %187 = tpu.matmul %185, %186, %cst_94 {dimension_numbers = #tpu.dot_dimension_numbers<[1], [1], [0], [0], [0, 0, 1, 0], [], []>} : vector<16x8xf32>, vector<16x8xf32>, vector<16x16xf32> -> vector<16x16xf32>
    %cst_95 = arith.constant 0.353553385 : f32
    %188 = vector.broadcast %cst_95 : f32 to vector<16x16xf32>
    %189 = arith.mulf %187, %188 : vector<16x16xf32>
    %cst_96 = arith.constant dense<0xFF800000> : vector<16xf32>
    %190 = vector.multi_reduction <maximumf>, %189, %cst_96 [1] : vector<16x16xf32> to vector<16xf32>
    %191 = vector.shape_cast %190 : vector<16xf32> to vector<16x1xf32>
    %192 = vector.broadcast %191 : vector<16x1xf32> to vector<16x16xf32>
    %193 = arith.subf %189, %192 : vector<16x16xf32>
    %194 = math.exp %193 : vector<16x16xf32>
    %cst_97 = arith.constant dense<0.000000e+00> : vector<16xf32>
    %195 = vector.multi_reduction <add>, %194, %cst_97 [1] : vector<16x16xf32> to vector<16xf32>
    %196 = vector.shape_cast %195 : vector<16xf32> to vector<16x1xf32>
    %197 = tpu.reciprocal %196 : vector<16x1xf32> -> vector<16x1xf32>
    %198 = vector.broadcast %197 : vector<16x1xf32> to vector<16x16xf32>
    %199 = arith.mulf %194, %198 : vector<16x16xf32>
    %200 = vector.extract_strided_slice %166 {offsets = [0, 8], sizes = [16, 8], strides = [1, 1]} : vector<16x32xf32> to vector<16x8xf32>
    %cst_98 = arith.constant dense<0.000000e+00> : vector<16x8xf32>
    %201 = tpu.matmul %199, %200, %cst_98 {dimension_numbers = #tpu.dot_dimension_numbers<[1], [0], [0], [1], [0, 0, 1, 1], [], []>} : vector<16x16xf32>, vector<16x8xf32>, vector<16x8xf32> -> vector<16x8xf32>
    %c0_99 = arith.constant 0 : index
    %c8_100 = arith.constant 8 : index
    %202 = vector.load %arg25[%c0_99, %c8_100] : memref<16x32xf32, #tpu.memory_space<vmem>>, vector<16x8xf32>
    tpu.vector_store %arg25[%c0_99, %c8_100], %201 {strides = array<i32>} : memref<16x32xf32, #tpu.memory_space<vmem>>, vector<16x8xf32>,
    %203 = vector.extract_strided_slice %164 {offsets = [0, 16], sizes = [16, 8], strides = [1, 1]} : vector<16x32xf32> to vector<16x8xf32>
    %204 = vector.extract_strided_slice %165 {offsets = [0, 16], sizes = [16, 8], strides = [1, 1]} : vector<16x32xf32> to vector<16x8xf32>
    %cst_101 = arith.constant dense<0.000000e+00> : vector<16x16xf32>
    %205 = tpu.matmul %203, %204, %cst_101 {dimension_numbers = #tpu.dot_dimension_numbers<[1], [1], [0], [0], [0, 0, 1, 0], [], []>} : vector<16x8xf32>, vector<16x8xf32>, vector<16x16xf32> -> vector<16x16xf32>
    %cst_102 = arith.constant 0.353553385 : f32
    %206 = vector.broadcast %cst_102 : f32 to vector<16x16xf32>
    %207 = arith.mulf %205, %206 : vector<16x16xf32>
    %cst_103 = arith.constant dense<0xFF800000> : vector<16xf32>
    %208 = vector.multi_reduction <maximumf>, %207, %cst_103 [1] : vector<16x16xf32> to vector<16xf32>
    %209 = vector.shape_cast %208 : vector<16xf32> to vector<16x1xf32>
    %210 = vector.broadcast %209 : vector<16x1xf32> to vector<16x16xf32>
    %211 = arith.subf %207, %210 : vector<16x16xf32>
    %212 = math.exp %211 : vector<16x16xf32>
    %cst_104 = arith.constant dense<0.000000e+00> : vector<16xf32>
    %213 = vector.multi_reduction <add>, %212, %cst_104 [1] : vector<16x16xf32> to vector<16xf32>
    %214 = vector.shape_cast %213 : vector<16xf32> to vector<16x1xf32>
    %215 = tpu.reciprocal %214 : vector<16x1xf32> -> vector<16x1xf32>
    %216 = vector.broadcast %215 : vector<16x1xf32> to vector<16x16xf32>
    %217 = arith.mulf %212, %216 : vector<16x16xf32>
    %218 = vector.extract_strided_slice %166 {offsets = [0, 16], sizes = [16, 8], strides = [1, 1]} : vector<16x32xf32> to vector<16x8xf32>
    %cst_105 = arith.constant dense<0.000000e+00> : vector<16x8xf32>
    %219 = tpu.matmul %217, %218, %cst_105 {dimension_numbers = #tpu.dot_dimension_numbers<[1], [0], [0], [1], [0, 0, 1, 1], [], []>} : vector<16x16xf32>, vector<16x8xf32>, vector<16x8xf32> -> vector<16x8xf32>
    %c0_106 = arith.constant 0 : index
    %c16_107 = arith.constant 16 : index
    %220 = vector.load %arg25[%c0_106, %c16_107] : memref<16x32xf32, #tpu.memory_space<vmem>>, vector<16x8xf32>
    tpu.vector_store %arg25[%c0_106, %c16_107], %219 {strides = array<i32>} : memref<16x32xf32, #tpu.memory_space<vmem>>, vector<16x8xf32>,
    %221 = vector.extract_strided_slice %164 {offsets = [0, 24], sizes = [16, 8], strides = [1, 1]} : vector<16x32xf32> to vector<16x8xf32>
    %222 = vector.extract_strided_slice %165 {offsets = [0, 24], sizes = [16, 8], strides = [1, 1]} : vector<16x32xf32> to vector<16x8xf32>
    %cst_108 = arith.constant dense<0.000000e+00> : vector<16x16xf32>
    %223 = tpu.matmul %221, %222, %cst_108 {dimension_numbers = #tpu.dot_dimension_numbers<[1], [1], [0], [0], [0, 0, 1, 0], [], []>} : vector<16x8xf32>, vector<16x8xf32>, vector<16x16xf32> -> vector<16x16xf32>
    %cst_109 = arith.constant 0.353553385 : f32
    %224 = vector.broadcast %cst_109 : f32 to vector<16x16xf32>
    %225 = arith.mulf %223, %224 : vector<16x16xf32>
    %cst_110 = arith.constant dense<0xFF800000> : vector<16xf32>
    %226 = vector.multi_reduction <maximumf>, %225, %cst_110 [1] : vector<16x16xf32> to vector<16xf32>
    %227 = vector.shape_cast %226 : vector<16xf32> to vector<16x1xf32>
    %228 = vector.broadcast %227 : vector<16x1xf32> to vector<16x16xf32>
    %229 = arith.subf %225, %228 : vector<16x16xf32>
    %230 = math.exp %229 : vector<16x16xf32>
    %cst_111 = arith.constant dense<0.000000e+00> : vector<16xf32>
    %231 = vector.multi_reduction <add>, %230, %cst_111 [1] : vector<16x16xf32> to vector<16xf32>
    %232 = vector.shape_cast %231 : vector<16xf32> to vector<16x1xf32>
    %233 = tpu.reciprocal %232 : vector<16x1xf32> -> vector<16x1xf32>
    %234 = vector.broadcast %233 : vector<16x1xf32> to vector<16x16xf32>
    %235 = arith.mulf %230, %234 : vector<16x16xf32>
    %236 = vector.extract_strided_slice %166 {offsets = [0, 24], sizes = [16, 8], strides = [1, 1]} : vector<16x32xf32> to vector<16x8xf32>
    %cst_112 = arith.constant dense<0.000000e+00> : vector<16x8xf32>
    %237 = tpu.matmul %235, %236, %cst_112 {dimension_numbers = #tpu.dot_dimension_numbers<[1], [0], [0], [1], [0, 0, 1, 1], [], []>} : vector<16x16xf32>, vector<16x8xf32>, vector<16x8xf32> -> vector<16x8xf32>
    %c0_113 = arith.constant 0 : index
    %c24_114 = arith.constant 24 : index
    %238 = vector.load %arg25[%c0_113, %c24_114] : memref<16x32xf32, #tpu.memory_space<vmem>>, vector<16x8xf32>
    tpu.vector_store %arg25[%c0_113, %c24_114], %237 {strides = array<i32>} : memref<16x32xf32, #tpu.memory_space<vmem>>, vector<16x8xf32>,
    %c0_115 = arith.constant 0 : index
    %c0_116 = arith.constant 0 : index
    %239 = vector.load %arg25[%c0_115, %c0_116] : memref<16x32xf32, #tpu.memory_space<vmem>>, vector<16x32xf32>
    %c1_117 = arith.constant 1 : index
    %c0_118 = arith.constant 0 : index
    %c0_119 = arith.constant 0 : index
    %240 = vector.load %arg8[%c1_117, %c0_118, %c0_119] : memref<2x32x32xf32, #tpu.memory_space<vmem>>, vector<1x32x32xf32>
    %241 = vector.shape_cast %240 : vector<1x32x32xf32> to vector<32x32xf32>
    %cst_120 = arith.constant dense<0.000000e+00> : vector<16x32xf32>
    %242 = tpu.matmul %239, %241, %cst_120 {dimension_numbers = #tpu.dot_dimension_numbers<[1], [0], [0], [1], [0, 0, 1, 1], [], []>} : vector<16x32xf32>, vector<32x32xf32>, vector<16x32xf32> -> vector<16x32xf32>
    %c1_121 = arith.constant 1 : index
    %c0_122 = arith.constant 0 : index
    %c0_123 = arith.constant 0 : index
    %243 = vector.load %arg9[%c1_121, %c0_122, %c0_123] : memref<2x1x32xf32, #tpu.memory_space<vmem>>, vector<1x1x32xf32>
    %244 = vector.shape_cast %243 : vector<1x1x32xf32> to vector<1x32xf32>
    %245 = vector.broadcast %244 : vector<1x32xf32> to vector<16x32xf32>
    %246 = arith.addf %242, %245 : vector<16x32xf32>
    %247 = arith.addf %246, %142 : vector<16x32xf32>
    %c1_124 = arith.constant 1 : index
    %c0_125 = arith.constant 0 : index
    %c0_126 = arith.constant 0 : index
    %248 = vector.load %arg10[%c1_124, %c0_125, %c0_126] : memref<2x1x32xf32, #tpu.memory_space<vmem>>, vector<1x1x32xf32>
    %249 = vector.shape_cast %248 : vector<1x1x32xf32> to vector<1x32xf32>
    %250 = arith.mulf %142, %142 : vector<16x32xf32>
    %cst_127 = arith.constant dense<0.000000e+00> : vector<16xf32>
    %251 = vector.multi_reduction <add>, %250, %cst_127 [1] : vector<16x32xf32> to vector<16xf32>
    %252 = vector.shape_cast %251 : vector<16xf32> to vector<16x1xf32>
    %cst_128 = arith.constant 3.200000e+01 : f32
    %253 = vector.broadcast %cst_128 : f32 to vector<16x1xf32>
    %254 = arith.divf %252, %253 : vector<16x1xf32>
    %cst_129 = arith.constant 9.99999997E-7 : f32
    %255 = vector.broadcast %cst_129 : f32 to vector<16x1xf32>
    %256 = arith.addf %254, %255 : vector<16x1xf32>
    %257 = math.rsqrt %256 : vector<16x1xf32>
    %258 = vector.broadcast %257 : vector<16x1xf32> to vector<16x32xf32>
    %259 = arith.mulf %142, %258 : vector<16x32xf32>
    %260 = vector.broadcast %249 : vector<1x32xf32> to vector<16x32xf32>
    %261 = arith.mulf %259, %260 : vector<16x32xf32>
    %c1_130 = arith.constant 1 : index
    %c0_131 = arith.constant 0 : index
    %c0_132 = arith.constant 0 : index
    %262 = vector.load %arg11[%c1_130, %c0_131, %c0_132] : memref<2x32x128xf32, #tpu.memory_space<vmem>>, vector<1x32x128xf32>
    %263 = vector.shape_cast %262 : vector<1x32x128xf32> to vector<32x128xf32>
    %cst_133 = arith.constant dense<0.000000e+00> : vector<16x128xf32>
    %264 = tpu.matmul %261, %263, %cst_133 {dimension_numbers = #tpu.dot_dimension_numbers<[1], [0], [0], [1], [0, 0, 1, 1], [], []>} : vector<16x32xf32>, vector<32x128xf32>, vector<16x128xf32> -> vector<16x128xf32>
    %c1_134 = arith.constant 1 : index
    %c0_135 = arith.constant 0 : index
    %c0_136 = arith.constant 0 : index
    %265 = vector.load %arg12[%c1_134, %c0_135, %c0_136] : memref<2x1x128xf32, #tpu.memory_space<vmem>>, vector<1x1x128xf32>
    %266 = vector.shape_cast %265 : vector<1x1x128xf32> to vector<1x128xf32>
    %267 = vector.broadcast %266 : vector<1x128xf32> to vector<16x128xf32>
    %268 = arith.addf %264, %267 : vector<16x128xf32>
    %c1_137 = arith.constant 1 : index
    %c0_138 = arith.constant 0 : index
    %c0_139 = arith.constant 0 : index
    %269 = vector.load %arg13[%c1_137, %c0_138, %c0_139] : memref<2x128x32xf32, #tpu.memory_space<vmem>>, vector<1x128x32xf32>
    %270 = vector.shape_cast %269 : vector<1x128x32xf32> to vector<128x32xf32>
    %cst_140 = arith.constant dense<0.000000e+00> : vector<16x32xf32>
    %271 = tpu.matmul %268, %270, %cst_140 {dimension_numbers = #tpu.dot_dimension_numbers<[1], [0], [0], [1], [0, 0, 1, 1], [], []>} : vector<16x128xf32>, vector<128x32xf32>, vector<16x32xf32> -> vector<16x32xf32>
    %c1_141 = arith.constant 1 : index
    %c0_142 = arith.constant 0 : index
    %c0_143 = arith.constant 0 : index
    %272 = vector.load %arg14[%c1_141, %c0_142, %c0_143] : memref<2x1x32xf32, #tpu.memory_space<vmem>>, vector<1x1x32xf32>
    %273 = vector.shape_cast %272 : vector<1x1x32xf32> to vector<1x32xf32>
    %274 = vector.broadcast %273 : vector<1x32xf32> to vector<16x32xf32>
    %275 = arith.addf %271, %274 : vector<16x32xf32>
    %276 = arith.addf %275, %247 : vector<16x32xf32>
    %277 = tpu.iota {dimensions = array<i32: 0>} : vector<32x32xi32>
    %278 = tpu.iota {dimensions = array<i32: 1>} : vector<32x32xi32>
    %c0_i32 = arith.constant 0 : i32
    %279 = vector.broadcast %c0_i32 : i32 to vector<32x32xi32>
    %280 = arith.addi %277, %279 : vector<32x32xi32>
    %281 = arith.cmpi eq, %280, %278 : vector<32x32xi32>
    %282 = arith.extui %281 : vector<32x32xi1> to vector<32x32xi32>
    %283 = arith.sitofp %282 : vector<32x32xi32> to vector<32x32xf32>
    %cst_144 = arith.constant dense<0.000000e+00> : vector<32x16xf32>
    %284 = tpu.matmul %283, %276, %cst_144 {dimension_numbers = #tpu.dot_dimension_numbers<[1], [1], [0], [0], [0, 0, 1, 0], [], []>} : vector<32x32xf32>, vector<16x32xf32>, vector<32x16xf32> -> vector<32x16xf32>
    %c0_145 = arith.constant 0 : index
    %c0_146 = arith.constant 0 : index
    %c0_147 = arith.constant 0 : index
    %285 = vector.load %arg23[%c0_145, %c0_146, %c0_147] : memref<1x32x16xf32, #tpu.memory_space<vmem>>, vector<1x32x16xf32>
    %286 = vector.shape_cast %285 : vector<1x32x16xf32> to vector<32x16xf32>
    %287 = vector.shape_cast %284 : vector<32x16xf32> to vector<1x32x16xf32>
    tpu.vector_store %arg23[%c0_145, %c0_146, %c0_147], %287 {strides = array<i32>} : memref<1x32x16xf32, #tpu.memory_space<vmem>>, vector<1x32x16xf32>,
    %cst_148 = arith.constant dense<0.000000e+00> : vector<32xf32>
    %288 = vector.multi_reduction <add>, %276, %cst_148 [0] : vector<16x32xf32> to vector<32xf32>
    %289 = vector.shape_cast %288 : vector<32xf32> to vector<1x32xf32>
    %cst_149 = arith.constant 1.600000e+01 : f32
    %290 = vector.broadcast %cst_149 : f32 to vector<1x32xf32>
    %291 = arith.divf %289, %290 : vector<1x32xf32>
    %c0_150 = arith.constant 0 : index
    %c0_151 = arith.constant 0 : index
    %292 = vector.load %arg15[%c0_150, %c0_151] : memref<32x64xf32, #tpu.memory_space<vmem>>, vector<32x64xf32>
    %cst_152 = arith.constant dense<0.000000e+00> : vector<1x64xf32>
    %293 = tpu.matmul %291, %292, %cst_152 {dimension_numbers = #tpu.dot_dimension_numbers<[1], [0], [0], [1], [0, 0, 1, 1], [], []>} : vector<1x32xf32>, vector<32x64xf32>, vector<1x64xf32> -> vector<1x64xf32>
    %c0_153 = arith.constant 0 : index
    %c0_154 = arith.constant 0 : index
    %294 = vector.load %arg16[%c0_153, %c0_154] : memref<1x64xf32, #tpu.memory_space<vmem>>, vector<1x64xf32>
    %295 = arith.addf %293, %294 : vector<1x64xf32>
    %cst_155 = arith.constant 0.000000e+00 : f32
    %cst_156 = arith.constant 6.000000e+00 : f32
    %296 = vector.broadcast %cst_155 : f32 to vector<1x64xf32>
    %297 = arith.maximumf %296, %295 : vector<1x64xf32>
    %298 = vector.broadcast %cst_156 : f32 to vector<1x64xf32>
    %299 = arith.minimumf %298, %297 : vector<1x64xf32>
    %c0_157 = arith.constant 0 : index
    %c0_158 = arith.constant 0 : index
    %300 = vector.load %arg17[%c0_157, %c0_158] : memref<64x32xf32, #tpu.memory_space<vmem>>, vector<64x32xf32>
    %cst_159 = arith.constant dense<0.000000e+00> : vector<1x32xf32>
    %301 = tpu.matmul %299, %300, %cst_159 {dimension_numbers = #tpu.dot_dimension_numbers<[1], [0], [0], [1], [0, 0, 1, 1], [], []>} : vector<1x64xf32>, vector<64x32xf32>, vector<1x32xf32> -> vector<1x32xf32>
    %c0_160 = arith.constant 0 : index
    %c0_161 = arith.constant 0 : index
    %302 = vector.load %arg18[%c0_160, %c0_161] : memref<1x32xf32, #tpu.memory_space<vmem>>, vector<1x32xf32>
    %303 = arith.addf %301, %302 : vector<1x32xf32>
    %cst_162 = arith.constant 0.000000e+00 : f32
    %cst_163 = arith.constant 6.000000e+00 : f32
    %304 = vector.broadcast %cst_162 : f32 to vector<1x32xf32>
    %305 = arith.maximumf %304, %303 : vector<1x32xf32>
    %306 = vector.broadcast %cst_163 : f32 to vector<1x32xf32>
    %307 = arith.minimumf %306, %305 : vector<1x32xf32>
    %c0_164 = arith.constant 0 : index
    %c0_165 = arith.constant 0 : index
    %308 = vector.load %arg19[%c0_164, %c0_165] : memref<32x16xf32, #tpu.memory_space<vmem>>, vector<32x16xf32>
    %cst_166 = arith.constant dense<0.000000e+00> : vector<1x16xf32>
    %309 = tpu.matmul %307, %308, %cst_166 {dimension_numbers = #tpu.dot_dimension_numbers<[1], [0], [0], [1], [0, 0, 1, 1], [], []>} : vector<1x32xf32>, vector<32x16xf32>, vector<1x16xf32> -> vector<1x16xf32>
    %c0_167 = arith.constant 0 : index
    %c0_168 = arith.constant 0 : index
    %310 = vector.load %arg20[%c0_167, %c0_168] : memref<1x16xf32, #tpu.memory_space<vmem>>, vector<1x16xf32>
    %311 = arith.addf %309, %310 : vector<1x16xf32>
    %cst_169 = arith.constant 0.000000e+00 : f32
    %cst_170 = arith.constant 6.000000e+00 : f32
    %312 = vector.broadcast %cst_169 : f32 to vector<1x16xf32>
    %313 = arith.maximumf %312, %311 : vector<1x16xf32>
    %314 = vector.broadcast %cst_170 : f32 to vector<1x16xf32>
    %315 = arith.minimumf %314, %313 : vector<1x16xf32>
    %c0_171 = arith.constant 0 : index
    %c0_172 = arith.constant 0 : index
    %316 = vector.load %arg21[%c0_171, %c0_172] : memref<16x128xf32, #tpu.memory_space<vmem>>, vector<16x128xf32>
    %cst_173 = arith.constant dense<0.000000e+00> : vector<1x128xf32>
    %317 = tpu.matmul %315, %316, %cst_173 {dimension_numbers = #tpu.dot_dimension_numbers<[1], [0], [0], [1], [0, 0, 1, 1], [], []>} : vector<1x16xf32>, vector<16x128xf32>, vector<1x128xf32> -> vector<1x128xf32>
    %c0_174 = arith.constant 0 : index
    %c0_175 = arith.constant 0 : index
    %318 = vector.load %arg22[%c0_174, %c0_175] : memref<1x128xf32, #tpu.memory_space<vmem>>, vector<1x128xf32>
    %319 = arith.addf %317, %318 : vector<1x128xf32>
    %cst_176 = arith.constant dense<0xFF800000> : vector<1xf32>
    %320 = vector.multi_reduction <maximumf>, %319, %cst_176 [1] : vector<1x128xf32> to vector<1xf32>
    %321 = vector.shape_cast %320 : vector<1xf32> to vector<1x1xf32>
    %322 = vector.broadcast %321 : vector<1x1xf32> to vector<1x128xf32>
    %323 = arith.subf %319, %322 : vector<1x128xf32>
    %324 = math.exp %323 : vector<1x128xf32>
    %cst_177 = arith.constant dense<0.000000e+00> : vector<1xf32>
    %325 = vector.multi_reduction <add>, %324, %cst_177 [1] : vector<1x128xf32> to vector<1xf32>
    %326 = vector.shape_cast %325 : vector<1xf32> to vector<1x1xf32>
    %327 = tpu.reciprocal %326 : vector<1x1xf32> -> vector<1x1xf32>
    %328 = vector.broadcast %327 : vector<1x1xf32> to vector<1x128xf32>
    %329 = arith.mulf %324, %328 : vector<1x128xf32>
    %c0_178 = arith.constant 0 : index
    %c0_179 = arith.constant 0 : index
    %c0_180 = arith.constant 0 : index
    %330 = vector.load %arg24[%c0_178, %c0_179, %c0_180] : memref<1x1x128xf32, #tpu.memory_space<vmem>>, vector<1x1x128xf32>
    %331 = vector.shape_cast %330 : vector<1x1x128xf32> to vector<1x128xf32>
    %332 = vector.shape_cast %329 : vector<1x128xf32> to vector<1x1x128xf32>
    tpu.vector_store %arg24[%c0_178, %c0_179, %c0_180], %332 {strides = array<i32>} : memref<1x1x128xf32, #tpu.memory_space<vmem>>, vector<1x1x128xf32>,
    return
  }
  func.func @transform_0(%arg0: i32) -> (i32, i32, i32) {
    %c0_i32 = arith.constant 0 : i32
    %c0_i32_0 = arith.constant 0 : i32
    %c0_i32_1 = arith.constant 0 : i32
    return %arg0, %c0_i32, %c0_i32_0 : i32, i32, i32
  }
  func.func @transform_1(%arg0: i32) -> (i32, i32) {
    %c0_i32 = arith.constant 0 : i32
    %c0_i32_0 = arith.constant 0 : i32
    %c0_i32_1 = arith.constant 0 : i32
    return %c0_i32, %c0_i32_0 : i32, i32
  }
  func.func @transform_2(%arg0: i32) -> (i32, i32) {
    %c0_i32 = arith.constant 0 : i32
    %c0_i32_0 = arith.constant 0 : i32
    %c0_i32_1 = arith.constant 0 : i32
    return %c0_i32, %c0_i32_0 : i32, i32
  }
  func.func @transform_3(%arg0: i32) -> (i32, i32) {
    %c0_i32 = arith.constant 0 : i32
    %c0_i32_0 = arith.constant 0 : i32
    %c0_i32_1 = arith.constant 0 : i32
    return %c0_i32, %c0_i32_0 : i32, i32
  }
  func.func @transform_4(%arg0: i32) -> (i32, i32, i32) {
    %c0_i32 = arith.constant 0 : i32
    %c0_i32_0 = arith.constant 0 : i32
    %c0_i32_1 = arith.constant 0 : i32
    %c0_i32_2 = arith.constant 0 : i32
    return %c0_i32, %c0_i32_0, %c0_i32_1 : i32, i32, i32
  }
  func.func @transform_5(%arg0: i32) -> (i32, i32, i32) {
    %c0_i32 = arith.constant 0 : i32
    %c0_i32_0 = arith.constant 0 : i32
    %c0_i32_1 = arith.constant 0 : i32
    %c0_i32_2 = arith.constant 0 : i32
    return %c0_i32, %c0_i32_0, %c0_i32_1 : i32, i32, i32
  }
  func.func @transform_6(%arg0: i32) -> (i32, i32, i32) {
    %c0_i32 = arith.constant 0 : i32
    %c0_i32_0 = arith.constant 0 : i32
    %c0_i32_1 = arith.constant 0 : i32
    %c0_i32_2 = arith.constant 0 : i32
    return %c0_i32, %c0_i32_0, %c0_i32_1 : i32, i32, i32
  }
  func.func @transform_7(%arg0: i32) -> (i32, i32, i32) {
    %c0_i32 = arith.constant 0 : i32
    %c0_i32_0 = arith.constant 0 : i32
    %c0_i32_1 = arith.constant 0 : i32
    %c0_i32_2 = arith.constant 0 : i32
    return %c0_i32, %c0_i32_0, %c0_i32_1 : i32, i32, i32
  }
  func.func @transform_8(%arg0: i32) -> (i32, i32, i32) {
    %c0_i32 = arith.constant 0 : i32
    %c0_i32_0 = arith.constant 0 : i32
    %c0_i32_1 = arith.constant 0 : i32
    %c0_i32_2 = arith.constant 0 : i32
    return %c0_i32, %c0_i32_0, %c0_i32_1 : i32, i32, i32
  }
  func.func @transform_9(%arg0: i32) -> (i32, i32, i32) {
    %c0_i32 = arith.constant 0 : i32
    %c0_i32_0 = arith.constant 0 : i32
    %c0_i32_1 = arith.constant 0 : i32
    %c0_i32_2 = arith.constant 0 : i32
    return %c0_i32, %c0_i32_0, %c0_i32_1 : i32, i32, i32
  }
  func.func @transform_10(%arg0: i32) -> (i32, i32, i32) {
    %c0_i32 = arith.constant 0 : i32
    %c0_i32_0 = arith.constant 0 : i32
    %c0_i32_1 = arith.constant 0 : i32
    %c0_i32_2 = arith.constant 0 : i32
    return %c0_i32, %c0_i32_0, %c0_i32_1 : i32, i32, i32
  }
  func.func @transform_11(%arg0: i32) -> (i32, i32, i32) {
    %c0_i32 = arith.constant 0 : i32
    %c0_i32_0 = arith.constant 0 : i32
    %c0_i32_1 = arith.constant 0 : i32
    %c0_i32_2 = arith.constant 0 : i32
    return %c0_i32, %c0_i32_0, %c0_i32_1 : i32, i32, i32
  }
  func.func @transform_12(%arg0: i32) -> (i32, i32, i32) {
    %c0_i32 = arith.constant 0 : i32
    %c0_i32_0 = arith.constant 0 : i32
    %c0_i32_1 = arith.constant 0 : i32
    %c0_i32_2 = arith.constant 0 : i32
    return %c0_i32, %c0_i32_0, %c0_i32_1 : i32, i32, i32
  }
  func.func @transform_13(%arg0: i32) -> (i32, i32, i32) {
    %c0_i32 = arith.constant 0 : i32
    %c0_i32_0 = arith.constant 0 : i32
    %c0_i32_1 = arith.constant 0 : i32
    %c0_i32_2 = arith.constant 0 : i32
    return %c0_i32, %c0_i32_0, %c0_i32_1 : i32, i32, i32
  }
  func.func @transform_14(%arg0: i32) -> (i32, i32) {
    %c0_i32 = arith.constant 0 : i32
    %c0_i32_0 = arith.constant 0 : i32
    %c0_i32_1 = arith.constant 0 : i32
    return %c0_i32, %c0_i32_0 : i32, i32
  }
  func.func @transform_15(%arg0: i32) -> (i32, i32) {
    %c0_i32 = arith.constant 0 : i32
    %c0_i32_0 = arith.constant 0 : i32
    %c0_i32_1 = arith.constant 0 : i32
    return %c0_i32, %c0_i32_0 : i32, i32
  }
  func.func @transform_16(%arg0: i32) -> (i32, i32) {
    %c0_i32 = arith.constant 0 : i32
    %c0_i32_0 = arith.constant 0 : i32
    %c0_i32_1 = arith.constant 0 : i32
    return %c0_i32, %c0_i32_0 : i32, i32
  }
  func.func @transform_17(%arg0: i32) -> (i32, i32) {
    %c0_i32 = arith.constant 0 : i32
    %c0_i32_0 = arith.constant 0 : i32
    %c0_i32_1 = arith.constant 0 : i32
    return %c0_i32, %c0_i32_0 : i32, i32
  }
  func.func @transform_18(%arg0: i32) -> (i32, i32) {
    %c0_i32 = arith.constant 0 : i32
    %c0_i32_0 = arith.constant 0 : i32
    %c0_i32_1 = arith.constant 0 : i32
    return %c0_i32, %c0_i32_0 : i32, i32
  }
  func.func @transform_19(%arg0: i32) -> (i32, i32) {
    %c0_i32 = arith.constant 0 : i32
    %c0_i32_0 = arith.constant 0 : i32
    %c0_i32_1 = arith.constant 0 : i32
    return %c0_i32, %c0_i32_0 : i32, i32
  }
  func.func @transform_20(%arg0: i32) -> (i32, i32) {
    %c0_i32 = arith.constant 0 : i32
    %c0_i32_0 = arith.constant 0 : i32
    %c0_i32_1 = arith.constant 0 : i32
    return %c0_i32, %c0_i32_0 : i32, i32
  }
  func.func @transform_21(%arg0: i32) -> (i32, i32) {
    %c0_i32 = arith.constant 0 : i32
    %c0_i32_0 = arith.constant 0 : i32
    %c0_i32_1 = arith.constant 0 : i32
    return %c0_i32, %c0_i32_0 : i32, i32
  }
  func.func @transform_22(%arg0: i32) -> (i32, i32, i32) {
    %c0_i32 = arith.constant 0 : i32
    %c0_i32_0 = arith.constant 0 : i32
    %c0_i32_1 = arith.constant 0 : i32
    return %arg0, %c0_i32, %c0_i32_0 : i32, i32, i32
  }
  func.func @transform_23(%arg0: i32) -> (i32, i32, i32) {
    %c0_i32 = arith.constant 0 : i32
    %c0_i32_0 = arith.constant 0 : i32
    %c0_i32_1 = arith.constant 0 : i32
    return %arg0, %c0_i32, %c0_i32_0 : i32, i32, i32
  }
}

</mosaic_0001>

<bundles_post_ra>
// kernel: forward.1
= control target key start
LH: loop header
LB: loop body
LE: loop exit
PB: predicated region body
PF: predicated region fallthrough
CT: control target
= control target key end

     0   :  { %s5935_s0 = inlined_call_operand.vmem [shape: f32[2,16,48], index: 0, kind: input, shape index: {}]   ;;  %s5936_s1 = inlined_call_operand.vmem [shape: f32[48,32], index: 1, kind: input, shape index: {}]   ;;  %s5937_s2 = inlined_call_operand.vmem [shape: f32[1,32], index: 2, kind: input, shape index: {}]   ;;  %s5938_s3 = inlined_call_operand.vmem [shape: f32[16,32], index: 3, kind: input, shape index: {}]   ;;  %s5939_s4 = inlined_call_operand.vmem [shape: f32[2,1,32], index: 4, kind: input, shape index: {}]   ;;  %s5940_s5 = inlined_call_operand.vmem [shape: f32[2,32,96], index: 5, kind: input, shape index: {}]   ;;  %s5941_s6 = inlined_call_operand.vmem [shape: f32[2,1,96], index: 6, kind: input, shape index: {}]   ;;  %s5942_s7 = inlined_call_operand.vmem [shape: f32[2,32,32], index: 7, kind: input, shape index: {}]   ;;  %s5943_s8 = inlined_call_operand.vmem [shape: f32[2,1,32], index: 8, kind: input, shape index: {}]   ;;  %s5944_s9 = inlined_call_operand.vmem [shape: f32[2,1,32], index: 9, kind: input, shape index: {}]   ;;  %s5945_s10 = inlined_call_operand.vmem [shape: f32[2,32,128], index: 10, kind: input, shape index: {}]   ;;  %s5946_s11 = inlined_call_operand.vmem [shape: f32[2,1,128], index: 11, kind: input, shape index: {}]   ;;  %s5947_s12 = inlined_call_operand.vmem [shape: f32[2,128,32], index: 12, kind: input, shape index: {}]   ;;  %s5948_s13 = inlined_call_operand.vmem [shape: f32[2,1,32], index: 13, kind: input, shape index: {}]   ;;  %s5949_s14 = inlined_call_operand.vmem [shape: f32[32,64], index: 14, kind: input, shape index: {}]   ;;  %s5950_s15 = inlined_call_operand.vmem [shape: f32[1,64], index: 15, kind: input, shape index: {}]   ;;  %s5951_s16 = inlined_call_operand.vmem [shape: f32[64,32], index: 16, kind: input, shape index: {}]   ;;  %s5952_s17 = inlined_call_operand.vmem [shape: f32[1,32], index: 17, kind: input, shape index: {}]   ;;  %s5953_s18 = inlined_call_operand.vmem [shape: f32[32,16], index: 18, kind: input, shape index: {}]   ;;  %s5954_s19 = inlined_call_operand.vmem [shape: f32[1,16], index: 19, kind: input, shape index: {}]   ;;  %s5955_s20 = inlined_call_operand.vmem [shape: f32[16,128], index: 20, kind: input, shape index: {}]   ;;  %s5956_s21 = inlined_call_operand.vmem [shape: f32[1,128], index: 21, kind: input, shape index: {}]   ;;  %s5957_s22 = inlined_call_operand.vmem [shape: f32[2,32,16], index: 22, kind: output, shape index: {0}]   ;;  %s5958_s23 = inlined_call_operand.hbm [shape: f32[2,1,128], index: 23, kind: output, shape index: {1}]  }
   0x1   :  { %5996 = sst [smem:[#allocation12_spill]] %s5935_s0 }
   0x2   :  { %5997 = sst [smem:[#allocation13_spill]] %s5936_s1 }
   0x3   :  { %5998 = sst [smem:[#allocation14_spill]] %s5937_s2 }
   0x4   :  { %5999 = sst [smem:[#allocation15_spill]] %s5938_s3 }
   0x5   :  { %6000 = sst [smem:[#allocation16_spill]] %s5939_s4 }
   0x6   :  { %6001 = sst [smem:[#allocation17_spill]] %s5940_s5 }
   0x7   :  { %6002 = sst [smem:[#allocation18_spill]] %s5941_s6 }
   0x8   :  { %6003 = sst [smem:[#allocation19_spill]] %s5942_s7 }
   0x9   :  { %6004 = sst [smem:[#allocation20_spill]] %s5943_s8 }
   0xa   :  { %6005 = sst [smem:[#allocation21_spill]] %s5958_s23 }
   0xb   :  { %29 = vsyncpa [#allocation4], 0 }
   0xc   :  { %31 = vsyncpa [#allocation4 + $0x1], 0  ;;  %s5211_s4 = smov 0   ;;  %s5213_s30 = smov 0  }
   0xd   :  { %s5215_s24 = smov 0   ;;  %s5217_s25 = smov 0  }
   0xe LB: > { %6006 = sst [smem:[#allocation6_spill]] %s5059_s4  ;;  %s5232_s5 = sadd.s32 4294967295, %s5071_s25   ;;  %s5071_s25 = sphi %s5217_s25, %s6046_s25   ;;  %s5067_s24 = sphi %s5215_s24, %s6048_s24   ;;  %s5063_s30 = sphi %s5213_s30, %s6050_s30   ;;  %s5059_s4 = sphi %s5211_s4, %s6049_s4  }
   0xf   : > { %6007 = sst [smem:[#allocation7_spill]] %s5067_s24  ;;  %s3915_s1 = sadd.s32 4294967294, %s5071_s25  }
  0x10   : > { %6008 = sst [smem:[#allocation8_spill]] %s5071_s25  ;;  %s5236_s26 = sadd.s32 1, %s5071_s25  }
  0x11   : > { %6009 = sst [smem:[#allocation9_spill]] %s5236_s26  ;;  %s537_s2 = sadd.s32 1, %s5067_s24 }
  0x12   : > { %s534_s6 = ssub.s32 %s5071_s25, %s5236_s26  ;;  %p547_p0 = scmp.ne.s32.totalorder %s5067_s24, %s5063_s30 }
  0x13   : > { %p535_p1 = scmp.eq.s32.totalorder %s534_s6, 0  ;;  %p548_p2 = scmp.eq.s32.totalorder %s5232_s5, 1 }
  0x14   : > { %p553_p3 = scmp.ne.s32.totalorder %s5063_s30, %s5059_s4  ;;  %p554_p4 = scmp.eq.s32.totalorder %s3915_s1, 1 }
  0x15   : > { %s5247_s27 = scalar_select %p535_p1, %s5067_s24, %s537_s2  }
  0x16   : > { %p5249_p5 = por %p548_p2, %p547_p0  ;;  %p5253_p6 = por %p554_p4, %p553_p3 }
  0x17   : > { %6010 = sst [smem:[#allocation10_spill]] %s5247_s27  ;;  %p3918_p7 = scmp.ge.s32.totalorder %s5071_s25, 1 }
  0x18   : > { %s6012_s28 = scalar_select %p5253_p6, 1, 0 }
  0x19   : > { %p643_p8 = scmp.lt.s32.totalorder %s5071_s25, 3 }
  0x1a   : > { %6013 = sst [smem:[#allocation11_spill]] %s6012_s28 }
  0x1b   : > { %p644_p9 = pnand %p3918_p7, %p643_p8 }
  0x1c   : > { %s6014_s0 = sld [smem:[#allocation13_spill]] (!%p644_p9)  ;;  %p711_p10 = scmp.lt.s32.totalorder (!%p644_p9), %s5232_s5, 1  ;;  %vm736_vm0 = vcmask (!%p644_p9), 392192   ;;  %vm825_vm1 = vcmask (!%p644_p9), 261120   ;;  %vm947_vm2 = vcmask (!%p644_p9), 64512   ;;  %vm1033_vm4 = vcmask (!%p644_p9), 130048  }
  0x1d   : > { %647 = sbr.rel (%p644_p9) target bundleno = 7469 (0x1d2d), region = 108  ;;  %s6015_s2 = sld [smem:[#allocation12_spill]] (!%p644_p9)  ;;  %vm5346_vm3 = vmpackc.low (!%p644_p9), %vm947_vm2, %vm947_vm2  ;;  %vm1355_vm5 = vcmask (!%p644_p9), 130112   ;;  %vm1568_vm6 = vcmask (!%p644_p9), 195712   ;;  %vm1781_vm7 = vcmask (!%p644_p9), 261312   ;;  %vm5089_vm12 = vmmov (!%p644_p9), 0  }
  0x1e   : > { %s6016_s29 = sld [smem:[#allocation14_spill]] (!%p644_p9)  ;;  %s6017_s25 = sld [smem:[#allocation15_spill]] (!%p644_p9)  ;;  %vm4749_vm13 = vmpackc.low (!%p644_p9), %vm825_vm1, %vm825_vm1  ;;  %vm3569_vm14 = vcmask (!%p644_p9), 523264   ;;  %vm3801_vm15 = vcmask (!%p644_p9), 1040384  }
  0x1f   : > { %s6019_s26 = sld [smem:[#allocation17_spill]] (!%p644_p9)  ;;  %s6022_s4 = sld [smem:[#allocation18_spill]] (!%p644_p9) }
  0x20   : > { %s5977_s3 = smov (!%p644_p9), 88   ;;  %s5989_s24 = smov (!%p644_p9), 64  }
  0x21   : > { %s6027_s8 = sld [smem:[#allocation20_spill]] (!%p644_p9) }
  0x22   : > { %v723_v0 = vld [vmem:[%s6014_s0] sm:$0xff] (!%p644_p9)  ;;  %v724_v1 = vld [vmem:[%s6014_s0 + $0x8] sm:$0xff] (!%p644_p9)  ;;  %v725_v2 = vld [vmem:[%s6014_s0 + $0x10] sm:$0xff] (!%p644_p9) }
  0x23   : > { %v4544_v3 = vpack.c.bf16 (!%p644_p9), %v724_v1, %v723_v0  ;;  %v726_v4 = vld [vmem:[%s6014_s0 + $0x18] sm:$0xff] (!%p644_p9)  ;;  %v727_v6 = vld [vmem:[%s6014_s0 + $0x20] sm:$0xff] (!%p644_p9)  ;;  %v728_v7 = vld [vmem:[%s6014_s0 + $0x28] sm:$0xff] (!%p644_p9) }
  0x24   : > { %v4548_v5 = vpack.c.bf16 %v726_v4, %v725_v2  ;;  %s5279_s1 = scalar_select %p711_p10, %s5232_s5, 1  ;;  %v4552_v8 = vpack.c.bf16 %v728_v7, %v727_v6  ;;  %v3923_v11 = vld [vmem:[%s6016_s29] ss:$0 sm:$0xff]  ;;  %v819_v14 = vld [vmem:[%s6017_s25 + $0x8] sm:$0xff] }
  0x25   : > { %4545 = vmatprep.subr.bf16.mxu0 %v4544_v3  ;;  %s6018_s23 = smov %s6017_s25  ;;  %v849_v24 = vld [vmem:[%s6019_s26] sm:$0xff]  ;;  %v850_v25 = vld [vmem:[%s6019_s26 + $0x8] sm:$0xff]  ;;  %v851_v26 = vld [vmem:[%s6019_s26 + $0x10] sm:$0xff]  ;;  %s6020_s25 = sld [smem:[#allocation16_spill]] }
  0x26   : > { %4547 = vmatpush3.bf16.msra.mxu0 %v4544_v3  ;;  %s4049_s27 = sshll.u32 %s5279_s1, 4  ;;  %v818_v16 = vld [vmem:[%s6018_s23] sm:$0xff]  ;;  %v4556_v27 = vpack.c.bf16 %v850_v25, %v849_v24  ;;  %v852_v28 = vld [vmem:[%s6019_s26 + $0x18] sm:$0xff]  ;;  %s6023_s28 = smov %s6022_s4 }
  0x27   : > { %4549 = vmatprep.subr.bf16.mxu0 %v4548_v5  ;;  %s715_s6 = scalar_lea.vmem %s6015_s2, %s4049_s27  ;;  %v4560_v29 = vpack.c.bf16 %v852_v28, %v851_v26  ;;  %v3927_v43 = vld [vmem:[%s6022_s4] ss:$0 sm:$0xff]  ;;  %s5990_s29 = smov 96  }
  0x28   : > { %v721_v9 = vld [vmem:[%s715_s6] sm:$0xff]  ;;  %v722_v10 = vld [vmem:[%s715_s6 + $0x8] sm:$0xff]  ;;  %4557 = vmatprep.subr.bf16.mxu1 %v4556_v27  ;;  %s5982_s27 = smov 120   ;;  %s5978_s2 = smov 112  }
  0x29   : > { %4235 = vmatprep.mubr.msk.f32.mxu0 %vm736_vm0, %v721_v9  ;;  %4559 = vmatpush3.bf16.msra.mxu1 %v4556_v27  ;;  %s5973_s6 = smov 56   ;;  %s5976_s4 = smov 48  }
  0x2a   : > { %4551 = vmatpush3.bf16.msra.mxu0 %v4548_v5  ;;  %4561 = vmatprep.subr.bf16.mxu1 %v4560_v29  ;;  %s6030_s23 = smov 120  }
  0x2b   : > { %4553 = vmatprep.subr.bf16.mxu0 %v4552_v8  ;;  %s6021_s0 = smov %s6020_s25  ;;  %v3926_v37 = vld [vmem:[%s6020_s25] ss:$0 sm:$0xff]  ;;  %s5980_s25 = smov 80  }
  0x2d   : > { %4563 = vmatpush3.bf16.msra.mxu1 %v4560_v29 }
  0x2e   : > { %4555 = vmatpush3.bf16.msra.mxu0 %v4552_v8 }
  0x31   : > { %4236 = vmatmul.mubr.msk.f32.vlgmr.msra.gmra.mrb[0].mxu0 %vm736_vm0, %v722_v10 }
 0x104   : > { %v4237_v12 = vpop.f32.mrb[0].mxu0 }
 0x105   : > { %v815_v13 = vadd.f32 %v4237_v12, %v3923_v11  ;;  %v809_v15 = vpop.f32.mrb[1].mxu0 }
 0x106   : > { %v810_v17 = vadd.f32 %v3923_v11, %v809_v15 }
 0x107   : > { %v5294_v18 = vadd.f32 %v819_v14, %v815_v13 }
 0x108   : > { %v5296_v19 = vadd.f32 %v818_v16, %v810_v17 }
 0x109   : > { %v824_v22 = vmul.f32 %v5294_v18, %v5294_v18 }
 0x10a   : > { %v823_v20 = vmul.f32 %v5296_v19, %v5296_v19 }
 0x10b   : > { %v829_v23 = vsel %vm825_vm1, %v824_v22, 0.0 }
 0x10c   : > { %v826_v21 = vsel %vm825_vm1, %v823_v20, 0.0 }
 0x10d   : > { %827 = vadd.xlane.f32.xlu0 %v826_v21 }
 0x111   : > { %830 = vadd.xlane.f32.xlu0 %v829_v23 }
 0x19a   : > { %v828_v30 = vpop.xlane.xlu0 %827 }
 0x19b   : > { %v833_v31 = vmul.f32 0.03125, %v828_v30 }
 0x19d   : > { %v835_v32 = vadd.f32 1e-06, %v833_v31 }
 0x19e   : > { %v831_v33 = vpop.xlane.xlu0 %830 }
 0x19f   : > { %4933 = vrsqrt.f32 %v835_v32  ;;  %v834_v34 = vmul.f32 0.03125, %v831_v33 }
 0x1a1   : > { %v836_v35 = vadd.f32 1e-06, %v834_v34 }
 0x1a3   : > { %4935 = vrsqrt.f32 %v836_v35 }
 0x1a9   : > { %v4934_v36 = vpop.eup %4933 }
 0x1aa   : > { %v5320_v38 = vmul.f32 %v4934_v36, %v5296_v19 }
 0x1ac   : > { %v847_v39 = vmul.f32 %v3926_v37, %v5320_v38 }
 0x1ad   : > { %v4936_v40 = vpop.eup %4935 }
 0x1ae   : > { %v5324_v41 = vmul.f32 %v4936_v40, %v5294_v18  ;;  %4246 = vmatprep.mubr.msk.f32.mxu1 %vm825_vm1, %v847_v39 }
 0x1b0   : > { %v848_v42 = vmul.f32 %v3926_v37, %v5324_v41 }
 0x1b2   : > { %4247 = vmatmul.mubr.msk.f32.vlgmr.msra.gmra.mrb[0].mxu1 %vm825_vm1, %v848_v42 }
 0x285   : > { %v4248_v44 = vpop.f32.mrb[0].mxu1 }
 0x286   : > { %v5332_v45 = vadd.f32 %v4248_v44, %v3927_v43  ;;  %v932_v46 = vpop.f32.mrb[1].mxu1 }
 0x287   : > { %v5334_v47 = vadd.f32 %v3927_v43, %v932_v46 }
 0x289   : > { %4253 = vmatprep.mubr.msk.f32.mxu1 %vm947_vm2, %v5334_v47  ;;  %v5340_v48 = vpack.i.bf16 %v5332_v45, %v5334_v47 }
 0x28b   : > { %4854 = vrot.lane.b32.xlu1 %v5340_v48, %s5990_s29  ;;  %s6031_s29 = smov 80  }
 0x2fd   : > { %v4855_v49 = vpop.permute.xlu1 %4854 }
 0x2fe   : > { %v4857_v50 = vunpack.i.h.bf16 %v4855_v49  ;;  %v4856_v51 = vunpack.i.l.bf16 %v4855_v49 }
 0x300   : > { %v4564_v53 = vpack.c.bf16 %v4857_v50, %v4856_v51 }
 0x302   : > { %4566 = vmatprep.subr.msk.bf16.mxu1 %vm5346_vm3, %v4564_v53 }
 0x303   : > { %4569 = vmatpush3.bf16.xpose.msk.msra.mxu1 %vm5346_vm3, %v4564_v53 }
 0x30a   : > { %4254 = vmatmul.mubr.msk.f32.vlgmr.msra.gmra.mrb[2].mxu1 %vm947_vm2, %v5332_v45 }
 0x3dd   : > { %v4255_v54 = vpop.f32.mrb[2].mxu1 }
 0x3de   : > { %v1032_v55 = vmul.f32 0.35355338, %v4255_v54  ;;  %v1022_v56 = vpop.f32.mrb[3].mxu1 }
 0x3df   : > { %v1031_v57 = vmul.f32 0.35355338, %v1022_v56 }
 0x3e0   : > { %v1037_v58 = vsel %vm1033_vm4, %v1032_v55, -inf }
 0x3e1   : > { %1038 = vmax.xlane.f32.xlu0 %v1037_v58  ;;  %v1034_v59 = vsel %vm1033_vm4, %v1031_v57, -inf }
 0x3e2   : > { %1035 = vmax.xlane.f32.xlu1 %v1034_v59 }
 0x3f3   : > { %4864 = vrot.lane.b32.xlu1 %v5340_v48, %s5977_s3  ;;  %s5984_s3 = smov 16  }
 0x3f7   : > { %4859 = vrot.lane.b32.xlu0 %v5340_v48, %s5989_s24  ;;  %s5992_s24 = smov 24  }
 0x46e   : > { %v1039_v60 = vpop.xlane.xlu0 %1038 }
 0x46f   : > { %v1041_v61 = vsub.f32 %v1032_v55, %v1039_v60  ;;  %v1036_v62 = vpop.xlane.xlu1 %1035 }
 0x470   : > { %v1040_v63 = vsub.f32 %v1031_v57, %v1036_v62 }
 0x471   : > { %v1044_v0 = vmul.f32 1.442695, %v1041_v61 }
 0x472   : > { %v1042_v1 = vmul.f32 1.442695, %v1040_v63  ;;  %v4860_v2 = vpop.permute.xlu0 %4859 }
 0x473   : > { %4937 = vpow2.f32 %v1044_v0  ;;  %v4862_v3 = vunpack.i.h.bf16 %v4860_v2  ;;  %v4861_v4 = vunpack.i.l.bf16 %v4860_v2  ;;  %v4865_v5 = vpop.permute.xlu1 %4864 }
 0x474   : > { %v4867_v6 = vunpack.i.h.bf16 %v4865_v5  ;;  %v4866_v7 = vunpack.i.l.bf16 %v4865_v5  ;;  %4939 = vpow2.f32 %v1042_v1 }
 0x475   : > { %v4570_v8 = vpack.c.bf16 %v4862_v3, %v4861_v4 }
 0x476   : > { %v4574_v9 = vpack.c.bf16 %v4867_v6, %v4866_v7 }
 0x477   : > { %4571 = vmatprep.subr.bf16.mxu0 %v4570_v8 }
 0x478   : > { %4573 = vmatpush3.bf16.msra.mxu0 %v4570_v8 }
 0x479   : > { %4576 = vmatprep.subr.msk.bf16.mxu0 %vm5346_vm3, %v4574_v9 }
 0x47d   : > { %v4938_v10 = vpop.eup %4937 }
 0x47e   : > { %v1049_v11 = vsel %vm1033_vm4, %v4938_v10, 0.0  ;;  %v4940_v12 = vpop.eup %4939 }
 0x47f   : > { %1050 = vadd.xlane.f32.xlu0 %v1049_v11  ;;  %v1046_v13 = vsel %vm1033_vm4, %v4940_v12, 0.0 }
 0x483   : > { %1047 = vadd.xlane.f32.xlu0 %v1046_v13 }
 0x499   : > { %1145 = vrot.lane.b32.xlu0 %v5334_v47, %s5982_s27 }
 0x49d   : > { %1147 = vrot.lane.b32.xlu0 %v5332_v45, %s5982_s27  ;;  %s5988_s27 = smov 40  }
 0x50c   : > { %v1051_v14 = vpop.xlane.xlu0 %1050 }
 0x50d   : > { %4941 = vrcp.f32 %v1051_v14 }
 0x510   : > { %v1048_v15 = vpop.xlane.xlu0 %1047 }
 0x511   : > { %4943 = vrcp.f32 %v1048_v15 }
 0x514   : > { %v1146_v22 = vpop.permute.xlu0 %1145 }
 0x517   : > { %v4942_v16 = vpop.eup %4941 }
 0x518   : > { %v1055_v21 = vmul.f32 %v4942_v16, %v4938_v10  ;;  %v1148_v23 = vpop.permute.xlu0 %1147 }
 0x51b   : > { %v4944_v17 = vpop.eup %4943 }
 0x51c   : > { %v1054_v20 = vmul.f32 %v4944_v17, %v4940_v12 }
 0x51e   : > { %4260 = vmatprep.mubr.msk.f32.mxu0 %vm1033_vm4, %v1054_v20 }
 0x51f   : > { %4261 = vmatmul.mubr.msk.f32.vlgmr.msra.gmra.mrb[2].mxu0 %vm1033_vm4, %v1055_v21 }
 0x520   : > { %4579 = vmatpush3.bf16.xpose.msk.msra.mxu0 %vm5346_vm3, %v4574_v9  ;;  %4267 = vmatprep.mubr.msk.f32.mxu0 %vm947_vm2, %v1146_v22 }
 0x527   : > { %4268 = vmatmul.mubr.msk.f32.vlgmr.msra.gmra.mrb[4].mxu0 %vm947_vm2, %v1148_v23 }
 0x5f2   : > { %v4262_v24 = vpop.f32.mrb[2].mxu0 }
 0x5f3   : > { %1144 = vst.msk [vmem:[#allocation2 + $0x8] sm:$0xff] %vm947_vm2, %v4262_v24  ;;  %v1134_v25 = vpop.f32.mrb[3].mxu0 }
 0x5f4   : > { %1143 = vst.msk [vmem:[#allocation2] sm:$0xff] %vm947_vm2, %v1134_v25 }
 0x5fa   : > { %v4269_v26 = vpop.f32.mrb[4].mxu0 }
 0x5fb   : > { %v1237_v27 = vmul.f32 0.35355338, %v4269_v26  ;;  %v1227_v28 = vpop.f32.mrb[5].mxu0 }
 0x5fc   : > { %v1236_v29 = vmul.f32 0.35355338, %v1227_v28 }
 0x5fd   : > { %v1241_v30 = vsel %vm1033_vm4, %v1237_v27, -inf }
 0x5fe   : > { %1242 = vmax.xlane.f32.xlu1 %v1241_v30  ;;  %v1238_v31 = vsel %vm1033_vm4, %v1236_v29, -inf  ;;  %v1890_v30 = vld [vmem:[%s5945_s10 + $0x8] sm:$0xff] }
 0x5ff   : > { %1239 = vmax.xlane.f32.xlu0 %v1238_v31 }
 0x60f   : > { %4874 = vrot.lane.b32.xlu1 %v5340_v48, %s5980_s25  ;;  %s6034_s25 = smov 48  }
 0x613   : > { %1358 = vrot.lane.b32.xlu1 %v5334_v47, %s5978_s2 }
 0x68b   : > { %v1243_v32 = vpop.xlane.xlu1 %1242 }
 0x68c   : > { %v1245_v33 = vsub.f32 %v1237_v27, %v1243_v32  ;;  %v1240_v34 = vpop.xlane.xlu0 %1239 }
 0x68d   : > { %v1244_v35 = vsub.f32 %v1236_v29, %v1240_v34  ;;  %v1889_v29 = vld [vmem:[%s5945_s10] sm:$0xff] }
 0x68e   : > { %v1248_v36 = vmul.f32 1.442695, %v1245_v33  ;;  %v4612_v34 = vpack.c.bf16 %v1890_v30, %v1889_v29  ;;  %v1983_v29 = vld [vmem:[%s5947_s12 + $0x10] sm:$0xff]  ;;  %v1984_v30 = vld [vmem:[%s5947_s12 + $0x18] sm:$0xff] }
 0x68f   : > { %v1246_v37 = vmul.f32 1.442695, %v1244_v35  ;;  %v4875_v49 = vpop.permute.xlu1 %4874 }
 0x690   : > { %4945 = vpow2.f32 %v1248_v36  ;;  %v4877_v51 = vunpack.i.h.bf16 %v4875_v49  ;;  %v4876_v53 = vunpack.i.l.bf16 %v4875_v49  ;;  %v1891_v36 = vld [vmem:[%s5945_s10 + $0x10] sm:$0xff] }
 0x691   : > { %4947 = vpow2.f32 %v1246_v37  ;;  %v1892_v37 = vld [vmem:[%s5945_s10 + $0x18] sm:$0xff] }
 0x692   : > { %v4584_v57 = vpack.c.bf16 %v4877_v51, %v4876_v53 }
 0x693   : > { %v1359_v62 = vpop.permute.xlu1 %1358 }
 0x69a   : > { %v4946_v39 = vpop.eup %4945 }
 0x69b   : > { %v1253_v40 = vsel %vm1033_vm4, %v4946_v39, 0.0  ;;  %v4948_v42 = vpop.eup %4947 }
 0x69c   : > { %1254 = vadd.xlane.f32.xlu0 %v1253_v40  ;;  %v1250_v43 = vsel %vm1033_vm4, %v4948_v42, 0.0  ;;  %v4616_v40 = vpack.c.bf16 %v1892_v37, %v1891_v36  ;;  %v1985_v36 = vld [vmem:[%s5947_s12 + $0x20] sm:$0xff]  ;;  %v1986_v37 = vld [vmem:[%s5947_s12 + $0x28] sm:$0xff] }
 0x6a0   : > { %1251 = vadd.xlane.f32.xlu0 %v1250_v43 }
 0x6b6   : > { %4869 = vrot.lane.b32.xlu0 %v5340_v48, %s5973_s6  ;;  %s5974_s6 = smov 104  }
 0x6ba   : > { %1360 = vrot.lane.b32.xlu0 %v5332_v45, %s5978_s2  ;;  %s6026_s2 = sld [smem:[#allocation19_spill]] }
 0x729   : > { %v1255_v44 = vpop.xlane.xlu0 %1254 }
 0x72a   : > { %4949 = vrcp.f32 %v1255_v44 }
 0x72d   : > { %v1252_v46 = vpop.xlane.xlu0 %1251 }
 0x72e   : > { %4951 = vrcp.f32 %v1252_v46 }
 0x731   : > { %v4870_v50 = vpop.permute.xlu0 %4869 }
 0x732   : > { %v4872_v54 = vunpack.i.h.bf16 %v4870_v50  ;;  %v4871_v55 = vunpack.i.l.bf16 %v4870_v50 }
 0x734   : > { %v4580_v56 = vpack.c.bf16 %v4872_v54, %v4871_v55  ;;  %v4950_v58 = vpop.eup %4949 }
 0x735   : > { %v1259_v61 = vmul.f32 %v4950_v58, %v4946_v39  ;;  %v1361_v63 = vpop.permute.xlu0 %1360  ;;  %v3957_v39 = vld [vmem:[%s5944_s9] ss:$0 sm:$0xff] }
 0x736   : > { %4581 = vmatprep.subr.bf16.mxu1 %v4580_v56  ;;  %v1888_v44 = vmul.f32 %v3957_v39, %v5324_v41 }
 0x737   : > { %4583 = vmatpush3.bf16.msra.mxu1 %v4580_v56 }
 0x738   : > { %v4952_v59 = vpop.eup %4951  ;;  %4586 = vmatprep.subr.msk.bf16.mxu1 %vm5346_vm3, %v4584_v57 }
 0x739   : > { %v1258_v60 = vmul.f32 %v4952_v59, %v4948_v42  ;;  %v1887_v42 = vmul.f32 %v3957_v39, %v5320_v38  ;;  %v4628_v39 = vpack.c.bf16 %v1986_v37, %v1985_v36 }
 0x73b   : > { %4274 = vmatprep.mubr.msk.f32.mxu1 %vm1033_vm4, %v1258_v60 }
 0x73c   : > { %4275 = vmatmul.mubr.msk.f32.vlgmr.msra.gmra.mrb[4].mxu1 %vm1033_vm4, %v1259_v61 }
 0x73d   : > { %4281 = vmatprep.mubr.msk.f32.mxu1 %vm947_vm2, %v1359_v62 }
 0x740   : > { %4589 = vmatpush3.bf16.xpose.msk.msra.mxu1 %vm5346_vm3, %v4584_v57 }
 0x747   : > { %4282 = vmatmul.mubr.msk.f32.vlgmr.msra.gmra.mrb[6].mxu1 %vm947_vm2, %v1361_v63 }
 0x80f   : > { %v5398_v0 = vpop.f32.mrb[4].mxu1 }
 0x810   : > { %v5400_v1 = vpop.f32.mrb[5].mxu1 }
 0x81a   : > { %v4283_v2 = vpop.f32.mrb[6].mxu1 }
 0x81b   : > { %v1450_v3 = vmul.f32 0.35355338, %v4283_v2  ;;  %v1440_v4 = vpop.f32.mrb[7].mxu1 }
 0x81c   : > { %v1449_v5 = vmul.f32 0.35355338, %v1440_v4 }
 0x81d   : > { %v1454_v6 = vsel %vm1033_vm4, %v1450_v3, -inf }
 0x81e   : > { %1455 = vmax.xlane.f32.xlu0 %v1454_v6  ;;  %v1451_v7 = vsel %vm1033_vm4, %v1449_v5, -inf }
 0x81f   : > { %1452 = vmax.xlane.f32.xlu1 %v1451_v7 }
 0x830   : > { %4879 = vrot.lane.b32.xlu1 %v5340_v48, %s5976_s4  ;;  %s6033_s4 = smov 88  }
 0x834   : > { %1571 = vrot.lane.b32.xlu1 %v5334_v47, %s5974_s6 }
 0x838   : > { %1573 = vrot.lane.b32.xlu1 %v5332_v45, %s5974_s6  ;;  %s5981_s6 = smov 72  }
 0x8ab   : > { %v1456_v8 = vpop.xlane.xlu0 %1455 }
 0x8ac   : > { %v1458_v9 = vsub.f32 %v1450_v3, %v1456_v8  ;;  %v1453_v10 = vpop.xlane.xlu1 %1452 }
 0x8ad   : > { %v1457_v11 = vsub.f32 %v1449_v5, %v1453_v10 }
 0x8ae   : > { %v1461_v12 = vmul.f32 1.442695, %v1458_v9 }
 0x8af   : > { %v1459_v13 = vmul.f32 1.442695, %v1457_v11 }
 0x8b0   : > { %4953 = vpow2.f32 %v1461_v12  ;;  %v4880_v14 = vpop.permute.xlu1 %4879 }
 0x8b1   : > { %v4882_v15 = vunpack.i.h.bf16 %v4880_v14  ;;  %v4881_v16 = vunpack.i.l.bf16 %v4880_v14  ;;  %4955 = vpow2.f32 %v1459_v13 }
 0x8b3   : > { %v4590_v17 = vpack.c.bf16 %v4882_v15, %v4881_v16 }
 0x8b4   : > { %v1572_v35 = vpop.permute.xlu1 %1571 }
 0x8b5   : > { %4591 = vmatprep.subr.bf16.mxu0 %v4590_v17 }
 0x8b6   : > { %4593 = vmatpush3.bf16.msra.mxu0 %v4590_v17  ;;  %v1787_v17 = vld [vmem:[%s6026_s2 + $0x8] sm:$0xff] }
 0x8b8   : > { %v1574_v43 = vpop.permute.xlu1 %1573 }
 0x8ba   : > { %v4954_v20 = vpop.eup %4953 }
 0x8bb   : > { %v1466_v47 = vsel %vm1033_vm4, %v4954_v20, 0.0  ;;  %v4956_v21 = vpop.eup %4955 }
 0x8bc   : > { %1467 = vadd.xlane.f32.xlu0 %v1466_v47  ;;  %v1463_v45 = vsel %vm1033_vm4, %v4956_v21, 0.0  ;;  %v1788_v47 = vld [vmem:[%s6026_s2 + $0x10] sm:$0xff] }
 0x8c0   : > { %1464 = vadd.xlane.f32.xlu0 %v1463_v45 }
 0x8d6   : > { %4884 = vrot.lane.b32.xlu0 %v5340_v48, %s5981_s6  ;;  %s5986_s6 = smov 8  }
 0x949   : > { %v1468_v22 = vpop.xlane.xlu0 %1467 }
 0x94a   : > { %4957 = vrcp.f32 %v1468_v22  ;;  %v1981_v22 = vld [vmem:[%s5947_s12] sm:$0xff] }
 0x94d   : > { %v1465_v23 = vpop.xlane.xlu0 %1464 }
 0x94e   : > { %4959 = vrcp.f32 %v1465_v23  ;;  %v1982_v23 = vld [vmem:[%s5947_s12 + $0x8] sm:$0xff] }
 0x951   : > { %v4885_v24 = vpop.permute.xlu0 %4884 }
 0x952   : > { %v4887_v25 = vunpack.i.h.bf16 %v4885_v24  ;;  %v4886_v26 = vunpack.i.l.bf16 %v4885_v24  ;;  %v4620_v24 = vpack.c.bf16 %v1982_v23, %v1981_v22 }
 0x954   : > { %v4594_v27 = vpack.c.bf16 %v4887_v25, %v4886_v26  ;;  %v4958_v28 = vpop.eup %4957 }
 0x955   : > { %v1472_v33 = vmul.f32 %v4958_v28, %v4954_v20 }
 0x956   : > { %4596 = vmatprep.subr.msk.bf16.mxu0 %vm5346_vm3, %v4594_v27 }
 0x958   : > { %v4960_v31 = vpop.eup %4959 }
 0x959   : > { %v1471_v32 = vmul.f32 %v4960_v31, %v4956_v21  ;;  %v1789_v21 = vld [vmem:[%s6026_s2 + $0x18] sm:$0xff]  ;;  %v3958_v31 = vld [vmem:[%s5946_s11] ss:$0 sm:$0xff] }
 0x95a   : > { %v4608_v45 = vpack.c.bf16 %v1789_v21, %v1788_v47 }
 0x95b   : > { %4288 = vmatprep.mubr.msk.f32.mxu0 %vm1033_vm4, %v1471_v32 }
 0x95c   : > { %4289 = vmatmul.mubr.msk.f32.vlgmr.msra.gmra.mrb[6].mxu0 %vm1033_vm4, %v1472_v33  ;;  %v4624_v33 = vpack.c.bf16 %v1984_v30, %v1983_v29  ;;  %v3969_v29 = vld [vmem:[%s6023_s28 + $0x1] ss:$0 sm:$0xff] }
 0x95d   : > { %4599 = vmatpush3.bf16.xpose.msk.msra.mxu0 %vm5346_vm3, %v4594_v27  ;;  %4295 = vmatprep.mubr.msk.f32.mxu0 %vm947_vm2, %v1572_v35 }
 0x95e   : > { %4613 = vmatprep.subr.bf16.mxu0 %v4612_v34 }
 0x964   : > { %4296 = vmatmul.mubr.msk.f32.vlgmr.msra.gmra.mrb[8].mxu0 %vm947_vm2, %v1574_v43 }
 0x965   : > { %4615 = vmatpush3.bf16.msra.mxu0 %v4612_v34  ;;  %4324 = vmatprep.mubr.msk.f32.mxu0 %vm825_vm1, %v1887_v42  ;;  %v1988_v42 = vld [vmem:[%s5947_s12 + $0x38] sm:$0xff] }
 0x966   : > { %4617 = vmatprep.subr.bf16.mxu0 %v4616_v40 }
 0x969   : > { %4619 = vmatpush3.bf16.msra.mxu0 %v4616_v40  ;;  %v1987_v40 = vld [vmem:[%s5947_s12 + $0x30] sm:$0xff] }
 0x96a   : > { %v4632_v43 = vpack.c.bf16 %v1988_v42, %v1987_v40 }
 0x96c   : > { %4325 = vmatmul.mubr.msk.f32.vlgmr.msra.gmra.mrb[10].mxu0 %vm825_vm1, %v1888_v44  ;;  %v1989_v44 = vld [vmem:[%s5947_s12 + $0x40] sm:$0xff] }
 0xa2f   : > { %v4290_v46 = vpop.f32.mrb[6].mxu0 }
 0xa30   : > { %v1551_v49 = vpop.f32.mrb[7].mxu0 }
 0xa37   : > { %v4297_v50 = vpop.f32.mrb[8].mxu0 }
 0xa38   : > { %v1663_v51 = vmul.f32 0.35355338, %v4297_v50  ;;  %v1653_v53 = vpop.f32.mrb[9].mxu0  ;;  %v1991_v50 = vld [vmem:[%s5947_s12 + $0x50] sm:$0xff] }
 0xa39   : > { %v1662_v54 = vmul.f32 0.35355338, %v1653_v53 }
 0xa3a   : > { %v1667_v38 = vsel %vm1033_vm4, %v1663_v51, -inf }
 0xa3b   : > { %1668 = vmax.xlane.f32.xlu0 %v1667_v38  ;;  %v1664_v55 = vsel %vm1033_vm4, %v1662_v54, -inf  ;;  %v1994_v38 = vld [vmem:[%s5947_s12 + $0x68] sm:$0xff] }
 0xa3c   : > { %1665 = vmax.xlane.f32.xlu1 %v1664_v55 }
 0xa3f   : > { %v5443_v56 = vpop.f32.mrb[10].mxu0 }
 0xa40   : > { %v5445_v57 = vpop.f32.mrb[11].mxu0 }
 0xa41   : > { %v1973_v34 = vadd.f32 %v3958_v31, %v5445_v57  ;;  %v1995_v57 = vld [vmem:[%s5947_s12 + $0x70] sm:$0xff] }
 0xa4d   : > { %4889 = vrot.lane.b32.xlu1 %v5340_v48, %s5988_s27  ;;  %s6032_s27 = smov 112  }
 0xa51   : > { %1351 = vrot.lane.b32.xlu1 %v5398_v0, %s5986_s6 }
 0xa55   : > { %1562 = vrot.lane.b32.xlu1 %v1551_v49, %s5984_s3 }
 0xa59   : > { %1564 = vrot.lane.b32.xlu1 %v4290_v46, %s5984_s3  ;;  %v1990_v46 = vld [vmem:[%s5947_s12 + $0x48] sm:$0xff]  ;;  %s6029_s3 = smov 64  }
 0xa5a   : > { %v4636_v49 = vpack.c.bf16 %v1990_v46, %v1989_v44 }
 0xac8   : > { %v1669_v41 = vpop.xlane.xlu0 %1668 }
 0xac9   : > { %v1671_v58 = vsub.f32 %v1663_v51, %v1669_v41  ;;  %v1666_v59 = vpop.xlane.xlu1 %1665  ;;  %v1992_v51 = vld [vmem:[%s5947_s12 + $0x58] sm:$0xff] }
 0xaca   : > { %v1670_v60 = vsub.f32 %v1662_v54, %v1666_v59  ;;  %v4640_v53 = vpack.c.bf16 %v1992_v51, %v1991_v50  ;;  %v1993_v54 = vld [vmem:[%s5947_s12 + $0x60] sm:$0xff]  ;;  %v1996_v41 = vld [vmem:[%s5947_s12 + $0x78] sm:$0xff]  ;;  %v1978_v59 = vadd.f32 %v5443_v56, %v3958_v31 }
 0xacb   : > { %v1674_v61 = vmul.f32 1.442695, %v1671_v58  ;;  %v4644_v55 = vpack.c.bf16 %v1994_v38, %v1993_v54  ;;  %v4648_v58 = vpack.c.bf16 %v1996_v41, %v1995_v57 }
 0xacc   : > { %v1672_v62 = vmul.f32 1.442695, %v1670_v60  ;;  %v5537_v60 = vld [vmem:[%s6027_s8] ss:$0 sm:$0xff] }
 0xacd   : > { %v4890_v63 = vpop.permute.xlu1 %4889 }
 0xace   : > { %4961 = vpow2.f32 %v1672_v62  ;;  %v4892_v2 = vunpack.i.h.bf16 %v4890_v63  ;;  %v4891_v3 = vunpack.i.l.bf16 %v4890_v63  ;;  %v4781_v62 = vadd.f32 %v5537_v60, %v5294_v18 }
 0xacf   : > { %4963 = vpow2.f32 %v1674_v61  ;;  %v3961_v61 = vld [vmem:[%s5948_s13] ss:$0 sm:$0xff] }
 0xad0   : > { %v4600_v48 = vpack.c.bf16 %v4892_v2, %v4891_v3  ;;  %v4784_v2 = vadd.f32 %v5537_v60, %v5296_v19 }
 0xad1   : > { %v1352_v4 = vpop.permute.xlu1 %1351 }
 0xad2   : > { %1357 = vst.msk [vmem:[#allocation2 + $0x8] sm:$0xff] %vm1355_vm5, %v1352_v4  ;;  %4601 = vmatprep.subr.bf16.mxu1 %v4600_v48 }
 0xad3   : > { %4603 = vmatpush3.bf16.msra.mxu1 %v4600_v48 }
 0xad5   : > { %v1563_v0 = vpop.permute.xlu1 %1562 }
 0xad8   : > { %v4962_v5 = vpop.eup %4961 }
 0xad9   : > { %v1565_v6 = vpop.permute.xlu1 %1564  ;;  %v1676_v7 = vsel %vm1033_vm4, %v4962_v5, 0.0  ;;  %v4964_v8 = vpop.eup %4963 }
 0xada   : > { %1570 = vst.msk [vmem:[#allocation2 + $0x8] sm:$0xff] %vm1568_vm6, %v1565_v6  ;;  %1677 = vadd.xlane.f32.xlu0 %v1676_v7  ;;  %v1679_v9 = vsel %vm1033_vm4, %v4964_v8, 0.0 }
 0xade   : > { %1680 = vadd.xlane.f32.xlu0 %v1679_v9 }
 0xaf4   : > { %1349 = vrot.lane.b32.xlu0 %v5400_v1, %s5986_s6  ;;  %v1786_v1 = vld [vmem:[%s6026_s2] sm:$0xff]  ;;  %s6035_s6 = smov 56  }
 0xaf5   : > { %v4604_v20 = vpack.c.bf16 %v1787_v17, %v1786_v1 }
 0xaf7   : > { %4605 = vmatprep.subr.bf16.mxu1 %v4604_v20 }
 0xb67   : > { %v1678_v10 = vpop.xlane.xlu0 %1677 }
 0xb68   : > { %4965 = vrcp.f32 %v1678_v10 }
 0xb6b   : > { %v1681_v11 = vpop.xlane.xlu0 %1680 }
 0xb6c   : > { %4967 = vrcp.f32 %v1681_v11  ;;  %v3964_v11 = vld [vmem:[%s6019_s26 + $0x20] sm:$0xff] }
 0xb6f   : > { %v1350_v12 = vpop.permute.xlu0 %1349 }
 0xb70   : > { %1356 = vst.msk [vmem:[#allocation2] sm:$0xff] %vm1355_vm5, %v1350_v12  ;;  %v3965_v12 = vld [vmem:[%s6019_s26 + $0x28] sm:$0xff] }
 0xb71   : > { %1569 = vst.msk [vmem:[#allocation2] sm:$0xff] %vm1568_vm6, %v1563_v0 }
 0xb72   : > { %v4966_v13 = vpop.eup %4965 }
 0xb73   : > { %v1684_v14 = vmul.f32 %v4966_v13, %v4962_v5  ;;  %v3966_v13 = vld [vmem:[%s6019_s26 + $0x30] sm:$0xff] }
 0xb75   : > { %4302 = vmatprep.mubr.msk.f32.mxu1 %vm1033_vm4, %v1684_v14  ;;  %v4652_v14 = vpack.c.bf16 %v3965_v12, %v3964_v11 }
 0xb76   : > { %v4968_v15 = vpop.eup %4967 }
 0xb77   : > { %v1685_v16 = vmul.f32 %v4968_v15, %v4964_v8  ;;  %v3967_v15 = vld [vmem:[%s6019_s26 + $0x38] sm:$0xff]  ;;  %4653 = vmatprep.subr.bf16.mxu0 %v4652_v14 }
 0xb78   : > { %4655 = vmatpush3.bf16.msra.mxu0 %v4652_v14 }
 0xb79   : > { %4303 = vmatmul.mubr.msk.f32.vlgmr.msra.gmra.mrb[8].mxu1 %vm1033_vm4, %v1685_v16  ;;  %v4656_v16 = vpack.c.bf16 %v3967_v15, %v3966_v13 }
 0xb7a   : > { %4607 = vmatpush3.bf16.msra.mxu1 %v4604_v20 }
 0xb7b   : > { %4609 = vmatprep.subr.bf16.mxu1 %v4608_v45  ;;  %4657 = vmatprep.subr.bf16.mxu0 %v4656_v16 }
 0xb7c   : > { %4659 = vmatpush3.bf16.msra.mxu0 %v4656_v16 }
 0xb7e   : > { %4611 = vmatpush3.bf16.msra.mxu1 %v4608_v45 }
 0xb7f   : > { %4621 = vmatprep.subr.bf16.mxu1 %v4620_v24 }
 0xc4c   : > { %v4304_v25 = vpop.f32.mrb[8].mxu1 }
 0xc4d   : > { %1777 = vrot.lane.b32.xlu1 %v4304_v25, %s5992_s24  ;;  %v1764_v26 = vpop.f32.mrb[9].mxu1 }
 0xc4e   : > { %1775 = vrot.lane.b32.xlu0 %v1764_v26, %s5992_s24  ;;  %s6028_s24 = smov 96  }
 0xcbf   : > { %v1778_v27 = vpop.permute.xlu1 %1777 }
 0xcc0   : > { %1783 = vst.msk [vmem:[#allocation2 + $0x8] sm:$0xff] %vm1781_vm7, %v1778_v27  ;;  %v1776_v28 = vpop.permute.xlu0 %1775 }
 0xcc1   : > { %1782 = vst.msk [vmem:[#allocation2] sm:$0xff] %vm1781_vm7, %v1776_v28 }
 0xcc7   : > { %v1785_v35 = vld [vmem:[#allocation2 + $0x8] sm:$0xff] }
 0xcc8   : > { %v1784_v32 = vld [vmem:[#allocation2] sm:$0xff] }
 0xcc9   : > { %4313 = vmatprep.mubr.msk.f32.mxu1 %vm825_vm1, %v1784_v32 }
 0xcca   : > { %4314 = vmatmul.mubr.msk.f32.vlgmr.msra.gmra.mrb[10].mxu1 %vm825_vm1, %v1785_v35 }
 0xccb   : > { %4623 = vmatpush3.bf16.msra.mxu1 %v4620_v24  ;;  %4359 = vmatprep.mubr.f32.mxu1 %v1973_v34  ;;  %v3963_v24 = vld [vmem:[%s6021_s0 + $0x1] ss:$0 sm:$0xff] }
 0xccc   : > { %4625 = vmatprep.subr.bf16.mxu1 %v4624_v33 }
 0xccf   : > { %4627 = vmatpush3.bf16.msra.mxu1 %v4624_v33 }
 0xcd0   : > { %4629 = vmatprep.subr.bf16.mxu1 %v4628_v39 }
 0xcd3   : > { %4631 = vmatpush3.bf16.msra.mxu1 %v4628_v39 }
 0xcd4   : > { %4633 = vmatprep.subr.bf16.mxu1 %v4632_v43 }
 0xcd7   : > { %4635 = vmatpush3.bf16.msra.mxu1 %v4632_v43 }
 0xcd8   : > { %4637 = vmatprep.subr.bf16.mxu1 %v4636_v49 }
 0xcdb   : > { %4639 = vmatpush3.bf16.msra.mxu1 %v4636_v49 }
 0xcdc   : > { %4641 = vmatprep.subr.bf16.mxu1 %v4640_v53 }
 0xcdf   : > { %4643 = vmatpush3.bf16.msra.mxu1 %v4640_v53 }
 0xce0   : > { %4645 = vmatprep.subr.bf16.mxu1 %v4644_v55 }
 0xce3   : > { %4647 = vmatpush3.bf16.msra.mxu1 %v4644_v55 }
 0xce4   : > { %4649 = vmatprep.subr.bf16.mxu1 %v4648_v58 }
 0xce7   : > { %4651 = vmatpush3.bf16.msra.mxu1 %v4648_v58 }
 0xcea   : > { %4360 = vmatmul.mubr.f32.vlgmr.msra.gmra.mrb[10].mxu1 %v1978_v59 }
 0xdbd   : > { %v4361_v63 = vpop.f32.mrb[10].mxu1 }
 0xdbe   : > { %v5546_v3 = vadd.f32 %v4361_v63, %v3961_v61  ;;  %v4782_v56 = vadd.f32 %v4781_v62, %v4361_v63  ;;  %v2070_v48 = vpop.f32.mrb[11].mxu1 }
 0xdbf   : > { %v5548_v4 = vadd.f32 %v3961_v61, %v2070_v48  ;;  %v4785_v0 = vadd.f32 %v4784_v2, %v2070_v48 }
 0xdc0   : > { %v4783_v5 = vadd.f32 %v4782_v56, %v3961_v61 }
 0xdc1   : > { %v4786_v6 = vadd.f32 %v4785_v0, %v3961_v61 }
 0xdc2   : > { %v2084_v7 = vmul.f32 %v4783_v5, %v4783_v5 }
 0xdc3   : > { %v2083_v8 = vmul.f32 %v4786_v6, %v4786_v6 }
 0xdc4   : > { %v2088_v9 = vsel %vm825_vm1, %v2084_v7, 0.0 }
 0xdc5   : > { %2089 = vadd.xlane.f32.xlu1 %v2088_v9  ;;  %v2085_v10 = vsel %vm825_vm1, %v2083_v8, 0.0 }
 0xdc6   : > { %2086 = vadd.xlane.f32.xlu0 %v2085_v10 }
 0xe52   : > { %v2090_v1 = vpop.xlane.xlu1 %2089 }
 0xe53   : > { %v2092_v17 = vmul.f32 0.03125, %v2090_v1  ;;  %v2087_v20 = vpop.xlane.xlu0 %2086 }
 0xe54   : > { %v2091_v47 = vmul.f32 0.03125, %v2087_v20 }
 0xe55   : > { %v2094_v21 = vadd.f32 1e-06, %v2092_v17 }
 0xe56   : > { %v2093_v45 = vadd.f32 1e-06, %v2091_v47 }
 0xe57   : > { %4969 = vrsqrt.f32 %v2094_v21 }
 0xe58   : > { %4971 = vrsqrt.f32 %v2093_v45 }
 0xe61   : > { %v4970_v22 = vpop.eup %4969 }
 0xe62   : > { %v4972_v23 = vpop.eup %4971  ;;  %v5567_v25 = vmul.f32 %v4970_v22, %v4783_v5 }
 0xe63   : > { %v5569_v26 = vmul.f32 %v4972_v23, %v4786_v6 }
 0xe64   : > { %v2106_v28 = vmul.f32 %v3963_v24, %v5567_v25 }
 0xe65   : > { %v2105_v27 = vmul.f32 %v3963_v24, %v5569_v26 }
 0xe67   : > { %4370 = vmatprep.mubr.msk.f32.mxu0 %vm825_vm1, %v2105_v27 }
 0xe68   : > { %4371 = vmatmul.mubr.msk.f32.vlgmr.msra.gmra.mrb[12].mxu0 %vm825_vm1, %v2106_v28 }
 0xf3b   : > { %v4372_v30 = vpop.f32.mrb[12].mxu0 }
 0xf3c   : > { %v5578_v31 = vadd.f32 %v4372_v30, %v3969_v29  ;;  %v2192_v32 = vpop.f32.mrb[13].mxu0 }
 0xf3d   : > { %v5580_v33 = vadd.f32 %v3969_v29, %v2192_v32 }
 0xf3f   : > { %4377 = vmatprep.mubr.msk.f32.mxu0 %vm947_vm2, %v5580_v33  ;;  %v5586_v34 = vpack.i.bf16 %v5578_v31, %v5580_v33 }
 0xf41   : > { %4894 = vrot.lane.b32.xlu0 %v5586_v34, %s6028_s24  ;;  %s6036_s24 = smov 72  }
 0xf45   : > { %4899 = vrot.lane.b32.xlu0 %v5586_v34, %s6029_s3  ;;  %s6037_s3 = smov 104  }
 0xf49   : > { %2403 = vrot.lane.b32.xlu0 %v5580_v33, %s6030_s23 }
 0xf4d   : > { %4909 = vrot.lane.b32.xlu0 %v5586_v34, %s6031_s29  ;;  %s6041_s29 = smov 24  }
 0xf51   : > { %2405 = vrot.lane.b32.xlu0 %v5578_v31, %s6030_s23 }
 0xf55   : > { %2615 = vrot.lane.b32.xlu0 %v5580_v33, %s6032_s27 }
 0xfb3   : > { %v4895_v35 = vpop.permute.xlu0 %4894 }
 0xfb4   : > { %v4897_v36 = vunpack.i.h.bf16 %v4895_v35  ;;  %v4896_v37 = vunpack.i.l.bf16 %v4895_v35 }
 0xfb6   : > { %v4660_v39 = vpack.c.bf16 %v4897_v36, %v4896_v37 }
 0xfb7   : > { %v4900_v40 = vpop.permute.xlu0 %4899 }
 0xfb8   : > { %v4902_v42 = vunpack.i.h.bf16 %v4900_v40  ;;  %v4901_v43 = vunpack.i.l.bf16 %v4900_v40  ;;  %4662 = vmatprep.subr.msk.bf16.mxu0 %vm5346_vm3, %v4660_v39 }
 0xfb9   : > { %4665 = vmatpush3.bf16.xpose.msk.msra.mxu0 %vm5346_vm3, %v4660_v39 }
 0xfba   : > { %v4666_v44 = vpack.c.bf16 %v4902_v42, %v4901_v43 }
 0xfbb   : > { %v2404_v46 = vpop.permute.xlu0 %2403 }
 0xfbc   : > { %4667 = vmatprep.subr.bf16.mxu0 %v4666_v44 }
 0xfbf   : > { %v4910_v49 = vpop.permute.xlu0 %4909 }
 0xfc0   : > { %v4912_v50 = vunpack.i.h.bf16 %v4910_v49  ;;  %v4911_v51 = vunpack.i.l.bf16 %v4910_v49  ;;  %4378 = vmatmul.mubr.msk.f32.vlgmr.msra.gmra.mrb[14].mxu0 %vm947_vm2, %v5578_v31 }
 0xfc1   : > { %4669 = vmatpush3.bf16.msra.mxu0 %v4666_v44 }
 0xfc2   : > { %v4680_v53 = vpack.c.bf16 %v4912_v50, %v4911_v51 }
 0xfc3   : > { %v2406_v54 = vpop.permute.xlu0 %2405 }
 0xfc4   : > { %4682 = vmatprep.subr.msk.bf16.mxu1 %vm5346_vm3, %v4680_v53 }
 0xfc5   : > { %4685 = vmatpush3.bf16.xpose.msk.msra.mxu1 %vm5346_vm3, %v4680_v53 }
 0xfc7   : > { %v2616_v38 = vpop.permute.xlu0 %2615 }
 0xfc8   : > { %4405 = vmatprep.mubr.msk.f32.mxu1 %vm947_vm2, %v2616_v38 }
0x1093   : > { %v4379_v55 = vpop.f32.mrb[14].mxu0 }
0x1094   : > { %v2281_v57 = vpop.f32.mrb[15].mxu0  ;;  %v2291_v58 = vmul.f32 0.35355338, %v4379_v55 }
0x1095   : > { %v2290_v41 = vmul.f32 0.35355338, %v2281_v57 }
0x1096   : > { %v2295_v61 = vsel %vm1033_vm4, %v2291_v58, -inf }
0x1097   : > { %v2292_v59 = vsel %vm1033_vm4, %v2290_v41, -inf }
0x1098   : > { %2293 = vmax.xlane.f32.xlu1 %v2292_v59 }
0x109c   : > { %2296 = vmax.xlane.f32.xlu1 %v2295_v61 }
0x1125   : > { %v2294_v62 = vpop.xlane.xlu1 %2293 }
0x1126   : > { %v2298_v63 = vsub.f32 %v2290_v41, %v2294_v62 }
0x1128   : > { %v2300_v48 = vmul.f32 1.442695, %v2298_v63 }
0x1129   : > { %v2297_v2 = vpop.xlane.xlu1 %2296 }
0x112a   : > { %v2299_v56 = vsub.f32 %v2291_v58, %v2297_v2 }
0x112c   : > { %v2302_v0 = vmul.f32 1.442695, %v2299_v56 }
0x112e   : > { %4973 = vpow2.f32 %v2302_v0 }
0x112f   : > { %4975 = vpow2.f32 %v2300_v48 }
0x1138   : > { %v4974_v5 = vpop.eup %4973 }
0x1139   : > { %v2307_v6 = vsel %vm1033_vm4, %v4974_v5, 0.0  ;;  %v4976_v7 = vpop.eup %4975 }
0x113a   : > { %2308 = vadd.xlane.f32.xlu1 %v2307_v6  ;;  %v2304_v8 = vsel %vm1033_vm4, %v4976_v7, 0.0 }
0x113e   : > { %2305 = vadd.xlane.f32.xlu1 %v2304_v8 }
0x114f   : > { %4904 = vrot.lane.b32.xlu1 %v5586_v34, %s6033_s4  ;;  %s6039_s4 = smov 8  }
0x1153   : > { %2617 = vrot.lane.b32.xlu1 %v5578_v31, %s6032_s27  ;;  %s6038_s27 = smov 40  }
0x11c7   : > { %v2309_v9 = vpop.xlane.xlu1 %2308 }
0x11c8   : > { %4977 = vrcp.f32 %v2309_v9 }
0x11cb   : > { %v2306_v10 = vpop.xlane.xlu1 %2305 }
0x11cc   : > { %4979 = vrcp.f32 %v2306_v10 }
0x11cf   : > { %v4905_v11 = vpop.permute.xlu1 %4904 }
0x11d0   : > { %v4907_v12 = vunpack.i.h.bf16 %v4905_v11  ;;  %v4906_v13 = vunpack.i.l.bf16 %v4905_v11 }
0x11d2   : > { %v4670_v14 = vpack.c.bf16 %v4907_v12, %v4906_v13  ;;  %v4978_v16 = vpop.eup %4977 }
0x11d3   : > { %v2618_v15 = vpop.permute.xlu1 %2617  ;;  %v2313_v20 = vmul.f32 %v4978_v16, %v4974_v5 }
0x11d4   : > { %4672 = vmatprep.subr.msk.bf16.mxu0 %vm5346_vm3, %v4670_v14  ;;  %4406 = vmatmul.mubr.msk.f32.vlgmr.msra.gmra.mrb[12].mxu1 %vm947_vm2, %v2618_v15 }
0x11d6   : > { %v4980_v1 = vpop.eup %4979 }
0x11d7   : > { %v2312_v17 = vmul.f32 %v4980_v1, %v4976_v7 }
0x11d9   : > { %4384 = vmatprep.mubr.msk.f32.mxu0 %vm1033_vm4, %v2312_v17 }
0x11da   : > { %4385 = vmatmul.mubr.msk.f32.vlgmr.msra.gmra.mrb[16].mxu0 %vm1033_vm4, %v2313_v20 }
0x11db   : > { %4675 = vmatpush3.bf16.xpose.msk.msra.mxu0 %vm5346_vm3, %v4670_v14  ;;  %4391 = vmatprep.mubr.msk.f32.mxu0 %vm947_vm2, %v2404_v46 }
0x11e2   : > { %4392 = vmatmul.mubr.msk.f32.vlgmr.msra.gmra.mrb[18].mxu0 %vm947_vm2, %v2406_v54 }
0x12a7   : > { %v4407_v47 = vpop.f32.mrb[12].mxu1 }
0x12a8   : > { %v2697_v21 = vpop.f32.mrb[13].mxu1  ;;  %v2707_v35 = vmul.f32 0.35355338, %v4407_v47 }
0x12a9   : > { %v2706_v30 = vmul.f32 0.35355338, %v2697_v21 }
0x12aa   : > { %v2711_v37 = vsel %vm1033_vm4, %v2707_v35, -inf }
0x12ab   : > { %v2708_v36 = vsel %vm1033_vm4, %v2706_v30, -inf }
0x12ad   : > { %v4386_v45 = vpop.f32.mrb[16].mxu0 }
0x12ae   : > { %2402 = vst.msk [vmem:[#allocation2 + $0x8] sm:$0xff] %vm947_vm2, %v4386_v45  ;;  %v2392_v22 = vpop.f32.mrb[17].mxu0 }
0x12af   : > { %2401 = vst.msk [vmem:[#allocation2] sm:$0xff] %vm947_vm2, %v2392_v22 }
0x12b5   : > { %v4393_v23 = vpop.f32.mrb[18].mxu0 }
0x12b6   : > { %v2495_v24 = vmul.f32 0.35355338, %v4393_v23  ;;  %v2485_v27 = vpop.f32.mrb[19].mxu0  ;;  %v4006_v23 = vld [vmem:[%s5945_s10 + $0x20] sm:$0xff] }
0x12b7   : > { %v2494_v28 = vmul.f32 0.35355338, %v2485_v27 }
0x12b8   : > { %v2499_v29 = vsel %vm1033_vm4, %v2495_v24, -inf }
0x12b9   : > { %2500 = vmax.xlane.f32.xlu1 %v2499_v29  ;;  %v2496_v32 = vsel %vm1033_vm4, %v2494_v28, -inf  ;;  %v4009_v29 = vld [vmem:[%s5945_s10 + $0x38] sm:$0xff] }
0x12ba   : > { %2497 = vmax.xlane.f32.xlu0 %v2496_v32 }
0x12be   : > { %2709 = vmax.xlane.f32.xlu0 %v2708_v36 }
0x12c2   : > { %2712 = vmax.xlane.f32.xlu0 %v2711_v37 }
0x1346   : > { %v2501_v42 = vpop.xlane.xlu1 %2500 }
0x1347   : > { %v2498_v39 = vpop.xlane.xlu0 %2497  ;;  %v2503_v46 = vsub.f32 %v2495_v24, %v2501_v42  ;;  %v4007_v24 = vld [vmem:[%s5945_s10 + $0x28] sm:$0xff] }
0x1348   : > { %v2502_v40 = vsub.f32 %v2494_v28, %v2498_v39  ;;  %v4708_v27 = vpack.c.bf16 %v4007_v24, %v4006_v23  ;;  %v4008_v28 = vld [vmem:[%s5945_s10 + $0x30] sm:$0xff]  ;;  %v4017_v24 = vld [vmem:[%s5947_s12 + $0x98] sm:$0xff] }
0x1349   : > { %v2506_v54 = vmul.f32 1.442695, %v2503_v46  ;;  %v4712_v32 = vpack.c.bf16 %v4009_v29, %v4008_v28  ;;  %v4016_v23 = vld [vmem:[%s5947_s12 + $0x90] sm:$0xff] }
0x134a   : > { %v2504_v49 = vmul.f32 1.442695, %v2502_v40  ;;  %v4720_v29 = vpack.c.bf16 %v4017_v24, %v4016_v23 }
0x134b   : > { %v2710_v43 = vpop.xlane.xlu0 %2709 }
0x134c   : > { %v2714_v44 = vsub.f32 %v2706_v30, %v2710_v43  ;;  %v4005_v30 = vld [vmem:[%s5944_s9 + $0x1] ss:$0 sm:$0xff] }
0x134d   : > { %v3145_v36 = vmul.f32 %v4005_v30, %v5569_v26  ;;  %v3146_v52 = vmul.f32 %v4005_v30, %v5567_v25 }
0x134e   : > { %v2716_v50 = vmul.f32 1.442695, %v2714_v44 }
0x134f   : > { %v2713_v51 = vpop.xlane.xlu0 %2712 }
0x1350   : > { %4981 = vpow2.f32 %v2716_v50  ;;  %v2715_v53 = vsub.f32 %v2707_v35, %v2713_v51 }
0x1351   : > { %4983 = vpow2.f32 %v2504_v49 }
0x1352   : > { %v2718_v38 = vmul.f32 1.442695, %v2715_v53 }
0x1354   : > { %4985 = vpow2.f32 %v2718_v38 }
0x1355   : > { %4987 = vpow2.f32 %v2506_v54 }
0x135a   : > { %v4982_v55 = vpop.eup %4981 }
0x135b   : > { %v2720_v57 = vsel %vm1033_vm4, %v4982_v55, 0.0  ;;  %v4984_v41 = vpop.eup %4983 }
0x135c   : > { %2721 = vadd.xlane.f32.xlu0 %v2720_v57  ;;  %v2508_v59 = vsel %vm1033_vm4, %v4984_v41, 0.0 }
0x135e   : > { %v4986_v58 = vpop.eup %4985 }
0x135f   : > { %v2723_v61 = vsel %vm1033_vm4, %v4986_v58, 0.0  ;;  %v4988_v62 = vpop.eup %4987 }
0x1360   : > { %2509 = vadd.xlane.f32.xlu0 %v2508_v59  ;;  %2724 = vadd.xlane.f32.xlu1 %v2723_v61  ;;  %v2511_v63 = vsel %vm1033_vm4, %v4988_v62, 0.0 }
0x1364   : > { %2512 = vadd.xlane.f32.xlu1 %v2511_v63 }
0x1375   : > { %4919 = vrot.lane.b32.xlu1 %v5586_v34, %s6034_s25  ;;  %s6040_s25 = smov 16  }
0x1376   : > { %4914 = vrot.lane.b32.xlu0 %v5586_v34, %s6035_s6 }
0x1379   : > { %4924 = vrot.lane.b32.xlu1 %v5586_v34, %s6036_s24 }
0x137a   : > { %2829 = vrot.lane.b32.xlu0 %v5578_v31, %s6037_s3 }
0x137d   : > { %2827 = vrot.lane.b32.xlu1 %v5580_v33, %s6037_s3 }
0x13e9   : > { %v2722_v2 = vpop.xlane.xlu0 %2721 }
0x13ed   : > { %v2725_v56 = vpop.xlane.xlu1 %2724  ;;  %v2510_v48 = vpop.xlane.xlu0 %2509 }
0x13ee   : > { %4989 = vrcp.f32 %v2510_v48 }
0x13ef   : > { %4991 = vrcp.f32 %v2722_v2 }
0x13f1   : > { %v2513_v0 = vpop.xlane.xlu1 %2512  ;;  %v4915_v5 = vpop.permute.xlu0 %4914 }
0x13f2   : > { %4993 = vrcp.f32 %v2513_v0  ;;  %v4917_v6 = vunpack.i.h.bf16 %v4915_v5  ;;  %v4916_v7 = vunpack.i.l.bf16 %v4915_v5 }
0x13f3   : > { %4995 = vrcp.f32 %v2725_v56 }
0x13f4   : > { %v4676_v8 = vpack.c.bf16 %v4917_v6, %v4916_v7 }
0x13f5   : > { %v4920_v9 = vpop.permute.xlu1 %4919  ;;  %v2830_v35 = vpop.permute.xlu0 %2829 }
0x13f6   : > { %v4922_v10 = vunpack.i.h.bf16 %v4920_v9  ;;  %v4921_v11 = vunpack.i.l.bf16 %v4920_v9  ;;  %4677 = vmatprep.subr.bf16.mxu0 %v4676_v8 }
0x13f7   : > { %4679 = vmatpush3.bf16.msra.mxu0 %v4676_v8 }
0x13f8   : > { %v4686_v31 = vpack.c.bf16 %v4922_v10, %v4921_v11  ;;  %v4990_v12 = vpop.eup %4989 }
0x13f9   : > { %v4925_v33 = vpop.permute.xlu1 %4924  ;;  %v2516_v13 = vmul.f32 %v4990_v12, %v4984_v41  ;;  %v4992_v14 = vpop.eup %4991  ;;  %v3996_v12 = vld [vmem:[%s6026_s2 + $0x20] sm:$0xff] }
0x13fa   : > { %4687 = vmatprep.subr.bf16.mxu0 %v4686_v31  ;;  %v4927_v15 = vunpack.i.h.bf16 %v4925_v33  ;;  %v4926_v16 = vunpack.i.l.bf16 %v4925_v33  ;;  %v2728_v47 = vmul.f32 %v4992_v14, %v4982_v55  ;;  %v3997_v33 = vld [vmem:[%s6026_s2 + $0x28] sm:$0xff]  ;;  %v3998_v14 = vld [vmem:[%s6026_s2 + $0x30] sm:$0xff] }
0x13fb   : > { %4398 = vmatprep.mubr.msk.f32.mxu0 %vm1033_vm4, %v2516_v13  ;;  %v4700_v13 = vpack.c.bf16 %v3997_v33, %v3996_v12 }
0x13fc   : > { %v4994_v1 = vpop.eup %4993  ;;  %v4690_v21 = vpack.c.bf16 %v4927_v15, %v4926_v16  ;;  %v3999_v15 = vld [vmem:[%s6026_s2 + $0x38] sm:$0xff] }
0x13fd   : > { %v2517_v17 = vmul.f32 %v4994_v1, %v4988_v62  ;;  %v4996_v20 = vpop.eup %4995  ;;  %v2828_v22 = vpop.permute.xlu1 %2827  ;;  %v4704_v16 = vpack.c.bf16 %v3999_v15, %v3998_v14  ;;  %v4014_v1 = vld [vmem:[%s5947_s12 + $0x80] sm:$0xff] }
0x13fe   : > { %v2729_v45 = vmul.f32 %v4996_v20, %v4986_v58  ;;  %v3480_v15 = vld [vmem:[%s5949_s14] sm:$0xff] }
0x13ff   : > { %4399 = vmatmul.mubr.msk.f32.vlgmr.msra.gmra.mrb[20].mxu0 %vm1033_vm4, %v2517_v17  ;;  %v4015_v17 = vld [vmem:[%s5947_s12 + $0x88] sm:$0xff] }
0x1400   : > { %4689 = vmatpush3.bf16.msra.mxu0 %v4686_v31  ;;  %4412 = vmatprep.mubr.msk.f32.mxu0 %vm1033_vm4, %v2728_v47  ;;  %v4716_v20 = vpack.c.bf16 %v4015_v17, %v4014_v1 }
0x1401   : > { %4692 = vmatprep.subr.msk.bf16.mxu0 %vm5346_vm3, %v4690_v21 }
0x1403   : > { %4413 = vmatmul.mubr.msk.f32.vlgmr.msra.gmra.mrb[22].mxu0 %vm1033_vm4, %v2729_v45 }
0x1404   : > { %4419 = vmatprep.mubr.msk.f32.mxu0 %vm947_vm2, %v2828_v22 }
0x1409   : > { %4695 = vmatpush3.bf16.xpose.msk.msra.mxu0 %vm5346_vm3, %v4690_v21 }
0x140a   : > { %4709 = vmatprep.subr.bf16.mxu0 %v4708_v27 }
0x1410   : > { %4420 = vmatmul.mubr.msk.f32.vlgmr.msra.gmra.mrb[24].mxu0 %vm947_vm2, %v2830_v35  ;;  %v4018_v35 = vld [vmem:[%s5947_s12 + $0xa0] sm:$0xff] }
0x1411   : > { %4711 = vmatpush3.bf16.msra.mxu0 %v4708_v27  ;;  %4448 = vmatprep.mubr.msk.f32.mxu0 %vm825_vm1, %v3145_v36  ;;  %v4011_v27 = vld [vmem:[%s5946_s11 + $0x1] ss:$0 sm:$0xff]  ;;  %v4019_v36 = vld [vmem:[%s5947_s12 + $0xa8] sm:$0xff] }
0x1412   : > { %4713 = vmatprep.subr.bf16.mxu0 %v4712_v32 }
0x1415   : > { %4715 = vmatpush3.bf16.msra.mxu0 %v4712_v32 }
0x1418   : > { %4449 = vmatmul.mubr.msk.f32.vlgmr.msra.gmra.mrb[26].mxu0 %vm825_vm1, %v3146_v52  ;;  %v4724_v52 = vpack.c.bf16 %v4019_v36, %v4018_v35  ;;  %v3561_v35 = vld [vmem:[%s5951_s16 + $0x8] sm:$0xff] }
0x14d2   : > { %v4400_v37 = vpop.f32.mrb[20].mxu0 }
0x14d3   : > { %v2596_v39 = vpop.f32.mrb[21].mxu0 }
0x14d6   : > { %v4414_v40 = vpop.f32.mrb[22].mxu0 }
0x14d7   : > { %v2808_v42 = vpop.f32.mrb[23].mxu0 }
0x14e3   : > { %v4421_v43 = vpop.f32.mrb[24].mxu0 }
0x14e4   : > { %v2919_v44 = vmul.f32 0.35355338, %v4421_v43  ;;  %v2909_v46 = vpop.f32.mrb[25].mxu0  ;;  %v4023_v43 = vld [vmem:[%s5947_s12 + $0xc8] sm:$0xff] }
0x14e5   : > { %v2918_v49 = vmul.f32 0.35355338, %v2909_v46  ;;  %v4024_v46 = vld [vmem:[%s5947_s12 + $0xd0] sm:$0xff] }
0x14e6   : > { %v2923_v26 = vsel %vm1033_vm4, %v2919_v44, -inf }
0x14e7   : > { %2924 = vmax.xlane.f32.xlu0 %v2923_v26  ;;  %v2920_v50 = vsel %vm1033_vm4, %v2918_v49, -inf }
0x14e8   : > { %2921 = vmax.xlane.f32.xlu1 %v2920_v50  ;;  %v4026_v50 = vld [vmem:[%s5947_s12 + $0xe0] sm:$0xff] }
0x14eb   : > { %v5679_v51 = vpop.f32.mrb[26].mxu0 }
0x14ec   : > { %v5681_v53 = vpop.f32.mrb[27].mxu0 }
0x14ed   : > { %v3233_v30 = vadd.f32 %v4011_v27, %v5681_v53  ;;  %v4027_v53 = vld [vmem:[%s5947_s12 + $0xe8] sm:$0xff] }
0x14f9   : > { %4929 = vrot.lane.b32.xlu1 %v5586_v34, %s6038_s27  ;;  %s4046_s27 = sshll.u32 %s5232_s5, 4  ;;  %s5090_s5 = smov [#allocation3]  }
0x14fa   : > { %s5013_s2 = sshll.u32 %s5090_s5, 4  ;;  %s5014_s2 = int_to_ptr.vmem [resolvable:$false] %s5013_s2 }
0x14fd   : > { %2609 = vrot.lane.b32.xlu1 %v4400_v37, %s6039_s4  ;;  %v4020_v37 = vld [vmem:[%s5947_s12 + $0xb0] sm:$0xff] }
0x1501   : > { %2819 = vrot.lane.b32.xlu1 %v2808_v42, %s6040_s25  ;;  %v4022_v42 = vld [vmem:[%s5947_s12 + $0xc0] sm:$0xff] }
0x1505   : > { %2821 = vrot.lane.b32.xlu1 %v4414_v40, %s6040_s25  ;;  %s4050_s25 = sshll.u32 %s5279_s1, 5  ;;  %s709_s1 = sand.u32 1, %s5063_s30  }
0x1506   : > { %s720_s3 = scalar_lea.vmem %s5957_s22, %s4050_s25 }
0x1574   : > { %v2925_v25 = vpop.xlane.xlu0 %2924 }
0x1575   : > { %v2927_v54 = vsub.f32 %v2919_v44, %v2925_v25  ;;  %v2922_v38 = vpop.xlane.xlu1 %2921  ;;  %v4732_v44 = vpack.c.bf16 %v4023_v43, %v4022_v42  ;;  %v4740_v25 = vpack.c.bf16 %v4027_v53, %v4026_v50  ;;  %v3565_v42 = vld [vmem:[%s5951_s16 + $0x28] sm:$0xff] }
0x1576   : > { %v2926_v55 = vsub.f32 %v2918_v49, %v2922_v38  ;;  %v4025_v49 = vld [vmem:[%s5947_s12 + $0xd8] sm:$0xff] }
0x1577   : > { %v2930_v57 = vmul.f32 1.442695, %v2927_v54  ;;  %v4736_v26 = vpack.c.bf16 %v4025_v49, %v4024_v46  ;;  %v4028_v54 = vld [vmem:[%s5947_s12 + $0xf0] sm:$0xff]  ;;  %v4029_v38 = vld [vmem:[%s5947_s12 + $0xf8] sm:$0xff] }
0x1578   : > { %v2928_v41 = vmul.f32 1.442695, %v2926_v55  ;;  %v4744_v55 = vpack.c.bf16 %v4029_v38, %v4028_v54  ;;  %v3567_v46 = vld [vmem:[%s5951_s16 + $0x38] sm:$0xff]  ;;  %v3484_v54 = vld [vmem:[%s5950_s15] sm:$0x1] }
0x1579   : > { %v4930_v58 = vpop.permute.xlu1 %4929 }
0x157a   : > { %4997 = vpow2.f32 %v2928_v41  ;;  %v4932_v59 = vunpack.i.h.bf16 %v4930_v58  ;;  %v4931_v61 = vunpack.i.l.bf16 %v4930_v58  ;;  %v3343_v41 = vlaneseq }
0x157b   : > { %4999 = vpow2.f32 %v2930_v57  ;;  %v3238_v57 = vadd.f32 %v5679_v51, %v4011_v27  ;;  %v1870_v51 = vadd.f32 nan, %v5537_v60 }
0x157c   : > { %v4696_v62 = vpack.c.bf16 %v4932_v59, %v4931_v61  ;;  %v3344_v58 = vshrl.u32 %v3343_v41, 7  ;;  %v3349_v59 = vand.u32 127, %v3343_v41 }
0x157d   : > { %v2610_v63 = vpop.permute.xlu1 %2609 }
0x157e   : > { %2614 = vst.msk [vmem:[#allocation2 + $0x8] sm:$0xff] %vm1355_vm5, %v2610_v63  ;;  %4697 = vmatprep.subr.bf16.mxu1 %v4696_v62  ;;  %v3345_v61 = vadd.s32 8, %v3344_v58  ;;  %vm3350_vm8 = vcmp.eq.s32.totalorder %v3344_v58, %v3349_v59 }
0x157f   : > { %4699 = vmatpush3.bf16.msra.mxu1 %v4696_v62  ;;  %v5087_v62 = vmov 0.0  }
0x1580   : > { %4701 = vmatprep.subr.bf16.mxu1 %v4700_v13  ;;  %v4032_v63 = vsel %vm3350_vm8, 1.0, %v5087_v62  ;;  %vm3351_vm9 = vcmp.eq.s32.totalorder %v3345_v61, %v3349_v59  ;;  %v3646_v61 = vld [vmem:[%s5953_s18 + $0x8] sm:$0xff] }
0x1581   : > { %v2820_v34 = vpop.permute.xlu1 %2819  ;;  %4490 = vmatprep.mubr.msk.f32.mxu0 %vm825_vm1, %v4032_v63 }
0x1584   : > { %v4998_v2 = vpop.eup %4997 }
0x1585   : > { %v2822_v56 = vpop.permute.xlu1 %2821  ;;  %v2932_v48 = vsel %vm1033_vm4, %v4998_v2, 0.0  ;;  %v5000_v0 = vpop.eup %4999 }
0x1586   : > { %2826 = vst.msk [vmem:[#allocation2 + $0x8] sm:$0xff] %vm1568_vm6, %v2822_v56  ;;  %2933 = vadd.xlane.f32.xlu0 %v2932_v48  ;;  %v2935_v5 = vsel %vm1033_vm4, %v5000_v0, 0.0  ;;  %v5088_v56 = vmov 0.0|0.0   ;;  %v1879_v48 = vadd.f32 %v1870_v51, %v5294_v18 }
0x158a   : > { %2936 = vadd.xlane.f32.xlu0 %v2935_v5  ;;  %v2080_v5 = vadd.f32 %v5546_v3, %v1879_v48 }
0x15a0   : > { %2607 = vrot.lane.b32.xlu0 %v2596_v39, %s6039_s4  ;;  %v4021_v39 = vld [vmem:[%s5947_s12 + $0xb8] sm:$0xff]  ;;  %s710_s4 = scalar_lea.vmem [#allocation3], %s709_s1 }
0x15a1   : > { %v4728_v40 = vpack.c.bf16 %v4021_v39, %v4020_v37  ;;  %v3563_v37 = vld [vmem:[%s5951_s16 + $0x18] sm:$0xff]  ;;  %s3835_s25 = sshll.u32 %s710_s4, 4  ;;  %s5895_s25 = int_to_ptr.vmem [resolvable:$true] %s3835_s25 }
0x15a2   : > { %s5009_s0 = scalar_lea.vmem %s5895_s25, 16  ;;  %p5016_p0 = scmp.lt.s32.totalorder %s5895_s25, %s5014_s2 }
0x15a3   : > { %p5010_p11 = scmp.ne.s32.totalorder %s5895_s25, %s5009_s0 }
0x15a5   : > { %p5011_p12 = pnand %p5010_p11, %p5249_p5 }
0x15a7   : > { %p5012_p13 = pneg %p5011_p12 }
0x1613   : > { %v2934_v6 = vpop.xlane.xlu0 %2933 }
0x1614   : > { %5001 = vrcp.f32 %v2934_v6 }
0x1617   : > { %v2937_v7 = vpop.xlane.xlu0 %2936 }
0x1618   : > { %5003 = vrcp.f32 %v2937_v7  ;;  %v4001_v7 = vld [vmem:[%s6027_s8 + $0x1] ss:$0 sm:$0xff]  ;;  %s5015_s8 = scalar_lea.vmem %s5014_s2, 32 }
0x1619   : > { %p5017_p1 = scmp.lt.s32.totalorder %s5015_s8, %s5009_s0 }
0x161b   : > { %v2608_v8 = vpop.permute.xlu0 %2607  ;;  %p5018_p2 = por %p5017_p1, %p5016_p0 }
0x161c   : > { %2613 = vst.msk [vmem:[#allocation2] sm:$0xff] %vm1355_vm5, %v2608_v8  ;;  %v4787_v8 = vadd.f32 %v4001_v7, %v2080_v5 }
0x161d   : > { %2825 = vst.msk [vmem:[#allocation2] sm:$0xff] %vm1568_vm6, %v2820_v34  ;;  %v3346_v34 = vadd.s32 16, %v3344_v58  ;;  %p5019_p3 = pnand %p5018_p2, %p5012_p13 }
0x161e   : > { %v5002_v9 = vpop.eup %5001 }
0x161f   : > { %v2940_v10 = vmul.f32 %v5002_v9, %v4998_v2  ;;  %v3347_v2 = vadd.s32 24, %v3344_v58  ;;  %vm3352_vm10 = vcmp.eq.s32.totalorder %v3346_v34, %v3349_v59  ;;  %v3647_v34 = vld [vmem:[%s5953_s18 + $0x10] sm:$0xff] }
0x1621   : > { %4426 = vmatprep.mubr.msk.f32.mxu1 %vm1033_vm4, %v2940_v10  ;;  %vm3353_vm11 = vcmp.eq.s32.totalorder %v3347_v2, %v3349_v59  ;;  %v4031_v10 = vld [vmem:[%s5948_s13 + $0x1] ss:$0 sm:$0xff] }
0x1622   : > { %v5004_v11 = vpop.eup %5003  ;;  %v4035_v27 = vsel %vm3353_vm11, 1.0, %v5087_v62  ;;  %v3645_v59 = vld [vmem:[%s5953_s18] sm:$0xff] }
0x1623   : > { %v2941_v31 = vmul.f32 %v5004_v11, %v5000_v0  ;;  %v1878_v0 = vadd.f32 %v1870_v51, %v5296_v19  ;;  %v4773_v63 = vpack.c.bf16 %v3646_v61, %v3645_v59  ;;  %v3568_v51 = vld [vmem:[%s5952_s17] sm:$0x1] }
0x1625   : > { %4427 = vmatmul.mubr.msk.f32.vlgmr.msra.gmra.mrb[14].mxu1 %vm1033_vm4, %v2941_v31  ;;  %v2079_v6 = vadd.f32 %v5548_v4, %v1878_v0 }
0x1626   : > { %4703 = vmatpush3.bf16.msra.mxu1 %v4700_v13 }
0x1627   : > { %4705 = vmatprep.subr.bf16.mxu1 %v4704_v16  ;;  %v4790_v11 = vadd.f32 %v4001_v7, %v2079_v6 }
0x162a   : > { %4707 = vmatpush3.bf16.msra.mxu1 %v4704_v16  ;;  %v3481_v16 = vld [vmem:[%s5949_s14 + $0x8] sm:$0xff] }
0x162b   : > { %4717 = vmatprep.subr.bf16.mxu1 %v4716_v20 }
0x16f8   : > { %v4428_v47 = vpop.f32.mrb[14].mxu1 }
0x16f9   : > { %3033 = vrot.lane.b32.xlu1 %v4428_v47, %s6041_s29  ;;  %v3020_v21 = vpop.f32.mrb[15].mxu1  ;;  %v4755_v47 = vpack.c.bf16 %v3481_v16, %v3480_v15 }
0x16fa   : > { %3031 = vrot.lane.b32.xlu0 %v3020_v21, %s6041_s29  ;;  %v4034_v21 = vsel %vm3352_vm10, 1.0, %v5087_v62  ;;  %s3820_s29 = scalar_lea.sflag [#allocation4], %s709_s1 }
0x176b   : > { %v3034_v45 = vpop.permute.xlu1 %3033 }
0x176c   : > { %3038 = vst.msk [vmem:[#allocation2 + $0x8] sm:$0xff] %vm1781_vm7, %v3034_v45  ;;  %v3032_v22 = vpop.permute.xlu0 %3031  ;;  %v3482_v45 = vld [vmem:[%s5949_s14 + $0x10] sm:$0xff] }
0x176d   : > { %3037 = vst.msk [vmem:[#allocation2] sm:$0xff] %vm1781_vm7, %v3032_v22  ;;  %v3483_v22 = vld [vmem:[%s5949_s14 + $0x18] sm:$0xff] }
0x1773   : > { %v3040_v32 = vld [vmem:[#allocation2 + $0x8] sm:$0xff] }
0x1774   : > { %v3039_v28 = vld [vmem:[#allocation2] sm:$0xff] }
0x1775   : > { %4437 = vmatprep.mubr.msk.f32.mxu1 %vm825_vm1, %v3039_v28  ;;  %v4758_v28 = vpack.c.bf16 %v3483_v22, %v3482_v45 }
0x1776   : > { %4438 = vmatmul.mubr.msk.f32.vlgmr.msra.gmra.mrb[16].mxu1 %vm825_vm1, %v3040_v32  ;;  %v3560_v32 = vld [vmem:[%s5951_s16] sm:$0xff] }
0x1777   : > { %4719 = vmatpush3.bf16.msra.mxu1 %v4716_v20  ;;  %4483 = vmatprep.mubr.f32.mxu1 %v3233_v30  ;;  %v4033_v20 = vsel %vm3351_vm9, 1.0, %v5087_v62  ;;  %v4761_v36 = vpack.c.bf16 %v3561_v35, %v3560_v32 }
0x1778   : > { %4721 = vmatprep.subr.bf16.mxu1 %v4720_v29 }
0x177b   : > { %4723 = vmatpush3.bf16.msra.mxu1 %v4720_v29 }
0x177c   : > { %4725 = vmatprep.subr.bf16.mxu1 %v4724_v52 }
0x177f   : > { %4727 = vmatpush3.bf16.msra.mxu1 %v4724_v52  ;;  %v3562_v52 = vld [vmem:[%s5951_s16 + $0x10] sm:$0xff] }
0x1780   : > { %4729 = vmatprep.subr.bf16.mxu1 %v4728_v40  ;;  %v4764_v39 = vpack.c.bf16 %v3563_v37, %v3562_v52 }
0x1783   : > { %4731 = vmatpush3.bf16.msra.mxu1 %v4728_v40  ;;  %v3564_v40 = vld [vmem:[%s5951_s16 + $0x20] sm:$0xff] }
0x1784   : > { %4733 = vmatprep.subr.bf16.mxu1 %v4732_v44  ;;  %v4767_v43 = vpack.c.bf16 %v3565_v42, %v3564_v40 }
0x1787   : > { %4735 = vmatpush3.bf16.msra.mxu1 %v4732_v44  ;;  %v3566_v44 = vld [vmem:[%s5951_s16 + $0x30] sm:$0xff] }
0x1788   : > { %4737 = vmatprep.subr.bf16.mxu1 %v4736_v26  ;;  %v4770_v49 = vpack.c.bf16 %v3567_v46, %v3566_v44 }
0x178b   : > { %4739 = vmatpush3.bf16.msra.mxu1 %v4736_v26 }
0x178c   : > { %4741 = vmatprep.subr.bf16.mxu1 %v4740_v25 }
0x178f   : > { %4743 = vmatpush3.bf16.msra.mxu1 %v4740_v25 }
0x1790   : > { %4745 = vmatprep.subr.bf16.mxu1 %v4744_v55 }
0x1793   : > { %4747 = vmatpush3.bf16.msra.mxu1 %v4744_v55 }
0x1794   : > { %4772 = vmatprep.subr.bf16.mxu1 %v5088_v56 }
0x1796   : > { %4484 = vmatmul.mubr.f32.vlgmr.msra.gmra.mrb[16].mxu1 %v3238_v57 }
0x1797   : > { %4534 = vmatprep.mubr.msk.f32.mxu1 %vm5089_vm12, %v5087_v62  ;;  %4774 = vmatpush3.bf16.msra.mxu1 %v4773_v63 }
0x1798   : > { %4775 = vmatprep.subr.bf16.mxu1 %v5088_v56 }
0x1869   : > { %v4485_v9 = vpop.f32.mrb[16].mxu1 }
0x186a   : > { %v4788_v60 = vadd.f32 %v4787_v8, %v4485_v9  ;;  %v3332_v31 = vpop.f32.mrb[17].mxu1  ;;  %v3726_v8 = vld [vmem:[%s5955_s20 + $0x8] sm:$0xff] }
0x186b   : > { %v4791_v18 = vadd.f32 %v4790_v11, %v3332_v31 }
0x186c   : > { %v4789_v12 = vadd.f32 %v4788_v60, %v4031_v10 }
0x186d   : > { %v4792_v19 = vadd.f32 %v4791_v18, %v4031_v10  ;;  %v3649_v10 = vld [vmem:[%s5954_s19] sm:$0x1] }
0x186e   : > { %v3470_v3 = vsel %vm825_vm1, %v4789_v12, 0.0 }
0x186f   : > { %v4748_v4 = vpack.c.bf16 %v4789_v12, %v4792_v19  ;;  %v3469_v33 = vsel %vm825_vm1, %v4792_v19, 0.0  ;;  %v3727_v19 = vld [vmem:[%s5956_s21] sm:$0x1] }
0x1870   : > { %v3471_v13 = vadd.f32 %v3470_v3, %v3469_v33 }
0x1871   : > { %4750 = vmatprep.subr.msk.bf16.mxu0 %vm4749_vm13, %v4748_v4 }
0x1872   : > { %v3472_v14 = vrot.slane %v3471_v13, 4  ;;  %4753 = vmatpush3.bf16.xpose.msk.msra.mxu0 %vm4749_vm13, %v4748_v4 }
0x1873   : > { %4754 = vmatprep.subr.bf16.mxu0 %v5088_v56 }
0x1874   : > { %v3473_v1 = vadd.f32 %v3472_v14, %v3471_v13 }
0x1876   : > { %v3474_v17 = vrot.slane %v3473_v1, 2 }
0x1878   : > { %v3475_v23 = vadd.f32 %v3474_v17, %v3473_v1 }
0x1879   : > { %4491 = vmatmul.mubr.msk.f32.vlgmr.msra.gmra.mrb[28].mxu0 %vm825_vm1, %v4033_v20 }
0x187a   : > { %v3476_v24 = vrot.slane %v3475_v23, 1  ;;  %4756 = vmatpush3.bf16.msra.mxu0 %v4755_v47  ;;  %4493 = vmatprep.mubr.msk.f32.mxu0 %vm825_vm1, %v4034_v21 }
0x187b   : > { %4757 = vmatprep.subr.bf16.mxu0 %v5088_v56 }
0x187c   : > { %v3477_v29 = vadd.f32 %v3476_v24, %v3475_v23 }
0x187d   : > { %4494 = vmatmul.mubr.msk.f32.gmra.mrb[30].mxu0 %vm825_vm1, %v4035_v27 }
0x187e   : > { %v3479_v30 = vmul.f32 0.0625, %v3477_v29  ;;  %4759 = vmatpush3.bf16.msra.mxu0 %v4758_v28  ;;  %4504 = vmatprep.mubr.msk.f32.mxu0 %vm5089_vm12, %v5087_v62 }
0x187f   : > { %4760 = vmatprep.subr.bf16.mxu0 %v5088_v56 }
0x1881   : > { %4505 = vmatmul.mubr.msk.f32.vlgmr.msra.gmra.mrb[32].mxu0 %vm825_vm1, %v3479_v30 }
0x1882   : > { %4523 = vmatprep.mubr.msk.f32.mxu0 %vm5089_vm12, %v5087_v62  ;;  %4762 = vmatpush3.bf16.msra.mxu0 %v4761_v36 }
0x1883   : > { %4763 = vmatprep.subr.bf16.mxu0 %v5088_v56 }
0x1886   : > { %4765 = vmatpush3.bf16.msra.mxu0 %v4764_v39 }
0x1887   : > { %4766 = vmatprep.subr.bf16.mxu0 %v5088_v56 }
0x188a   : > { %4768 = vmatpush3.bf16.msra.mxu0 %v4767_v43 }
0x188b   : > { %4769 = vmatprep.subr.bf16.mxu0 %v5088_v56 }
0x188e   : > { %4771 = vmatpush3.bf16.msra.mxu0 %v4770_v49 }
0x188f   : > { %4778 = vmatprep.subr.bf16.mxu0 %v5088_v56  ;;  %v3725_v56 = vld [vmem:[%s5955_s20] sm:$0xff] }
0x1890   : > { %v4779_v9 = vpack.c.bf16 %v3726_v8, %v3725_v56 }
0x194c   : > { %v4492_v26 = vpop.f32.mrb[28].mxu0 }
0x194d   : > { %3466 = vst.msk [vmem:[%s720_s3 + $0x8] sm:$0xff] %vm1033_vm4, %v4492_v26  ;;  %v3446_v50 = vpop.f32.mrb[29].mxu0 }
0x194e   : > { %3465 = vst.msk [vmem:[%s720_s3] sm:$0xff] %vm1033_vm4, %v3446_v50 }
0x1950   : > { %v4495_v53 = vpop.f32.mrb[30].mxu0 }
0x1951   : > { %3468 = vst.msk [vmem:[%s720_s3 + $0x18] sm:$0xff] %vm1033_vm4, %v4495_v53  ;;  %v3456_v25 = vpop.f32.mrb[31].mxu0 }
0x1952   : > { %3467 = vst.msk [vmem:[%s720_s3 + $0x10] sm:$0xff] %vm1033_vm4, %v3456_v25  ;;  %s6042_s3 = sld [smem:[#allocation21_spill]] }
0x1954   : > { %v3554_v38 = vpop.f32.mrb[32].mxu0 }
0x1955   : > { %v3555_v55 = vadd.f32 %v3554_v38, %v3484_v54  ;;  %v4506_v57 = vpop.f32.mrb[33].mxu0 }
0x1957   : > { %v3558_v41 = vmax.f32 %v3555_v55, 0.0 }
0x1958   : > { %s5893_s23 = scalar_lea.hbm %s6042_s3, %s4046_s27 }
0x1959   : > { %v3559_v58 = vmin.f32 %v3558_v41, 6.0 }
0x195b   : > { %4524 = vmatmul.mubr.msk.f32.vlgmr.msra.gmra.mrb[34].mxu0 %vm3569_vm14, %v3559_v58 }
0x195c   : > { %4541 = vmatprep.mubr.msk.f32.mxu0 %vm5089_vm12, %v5087_v62  ;;  %v3648_v62 = vld [vmem:[%s5953_s18 + $0x18] sm:$0xff]  ;;  %4780 = vmatpush3.bf16.msra.mxu0 %v4779_v9 }
0x195d   : > { %v4776_v2 = vpack.c.bf16 %v3648_v62, %v3647_v34 }
0x195f   : > { %4777 = vmatpush3.bf16.msra.mxu1 %v4776_v2 }
0x1a2e   : > { %v3639_v48 = vpop.f32.mrb[34].mxu0 }
0x1a2f   : > { %v3640_v0 = vadd.f32 %v3639_v48, %v3568_v51  ;;  %v4525_v5 = vpop.f32.mrb[35].mxu0 }
0x1a31   : > { %v3643_v6 = vmax.f32 %v3640_v0, 0.0 }
0x1a33   : > { %v3644_v7 = vmin.f32 %v3643_v6, 6.0 }
0x1a35   : > { %4535 = vmatmul.mubr.msk.f32.vlgmr.msra.gmra.mrb[18].mxu1 %vm825_vm1, %v3644_v7 }
0x1b08   : > { %v3719_v11 = vpop.f32.mrb[18].mxu1 }
0x1b09   : > { %v3720_v60 = vadd.f32 %v3719_v11, %v3649_v10  ;;  %v4536_v31 = vpop.f32.mrb[19].mxu1 }
0x1b0b   : > { %v3723_v18 = vmax.f32 %v3720_v60, 0.0 }
0x1b0d   : > { %v3724_v12 = vmin.f32 %v3723_v18, 6.0 }
0x1b0f   : > { %4542 = vmatmul.mubr.msk.f32.vlgmr.msra.gmra.mrb[36].mxu0 %vm1033_vm4, %v3724_v12 }
0x1be2   : > { %v3797_v3 = vpop.f32.mrb[36].mxu0 }
0x1be3   : > { %v3798_v4 = vadd.f32 %v3797_v3, %v3727_v19  ;;  %v4543_v33 = vpop.f32.mrb[37].mxu0 }
0x1be5   : > { %v3802_v13 = vsel %vm3801_vm15, %v3798_v4, -inf }
0x1be6   : > { %3803 = vmax.xlane.f32.xlu0 %v3802_v13 }
0x1c73   : > { %v3804_v14 = vpop.xlane.xlu0 %3803 }
0x1c74   : > { %v3805_v15 = vsub.f32 %v3798_v4, %v3804_v14 }
0x1c76   : > { %v3806_v16 = vmul.f32 1.442695, %v3805_v15 }
0x1c78   : > { %5005 = vpow2.f32 %v3806_v16 }
0x1c82   : > { %v5006_v1 = vpop.eup %5005 }
0x1c83   : > { %v3808_v17 = vsel %vm3801_vm15, %v5006_v1, 0.0 }
0x1c84   : > { %3809 = vadd.xlane.f32.xlu1 %v3808_v17 }
0x1d11   : > { %v3810_v20 = vpop.xlane.xlu1 %3809 }
0x1d12   : > { %5007 = vrcp.f32 %v3810_v20 }
0x1d1c   : > { %v5008_v47 = vpop.eup %5007 }
0x1d1d   : > { %v3812_v21 = vmul.f32 %v5008_v47, %v5006_v1 }
0x1d1f   : > { %3813 = vst [vmem:[%s710_s4] sm:$0x1] %v3812_v21 }
0x1d20   : > { %5022 = shalt.err (!%p5019_p3)
}
0x1d21   : > { %s5023_s1 = scalar_lea.hbm %s5893_s23, 16  ;;  %s5027_s6 = scalar_lea.hbm %s6042_s3, 32 }
0x1d22   : > { %p5024_p4 = scmp.ne.s32.totalorder %s5893_s23, %s5023_s1  ;;  %p5028_p9 = scmp.lt.u32.totalorder %s5893_s23, %s6042_s3 }
0x1d23   : > { %p5029_p10 = scmp.lt.u32.totalorder %s5027_s6, %s5023_s1  ;;  %p5031_p12 = scmp.lt.u32.totalorder %s5023_s1, %s5893_s23 }
0x1d24   : > { %p5025_p7 = pnand %p5024_p4, %p5249_p5 }
0x1d25   : > { %p5030_p11 = por %p5029_p10, %p5028_p9 }
0x1d26   : > { %p5026_p8 = pneg %p5025_p7 }
0x1d27   : > { %p5032_p13 = por %p5031_p12, %p5030_p11 }
0x1d29   : > { %p5033_p0 = pnand %p5032_p13, %p5026_p8 }
0x1d2b   : > { %5036 = shalt.err (!%p5033_p0)
}
0x1d2c   : > { %4797 = dma.vmem_to_hbm [thread:$0]  (%p5249_p5), %s5895_s25, 16, %s5893_s23, %s3820_s29  }
0x1d2d PF: > { %s6043_s8 = sld [smem:[#allocation8_spill]]  ;;  %s6044_s0 = sld [smem:[#allocation6_spill]] }
0x1d33   : > { %p4803_p1 = scmp.ge.s32.totalorder %s6043_s8, 2  ;;  %s3855_s27 = sand.u32 1, %s6044_s0  }
0x1d34   : > { %s3856_s4 = scalar_lea.sflag [#allocation4], %s3855_s27 }
0x1d35   : > { %p4800_p2 = pnand %p4803_p1, %p5253_p6 }
0x1d37   : > { %5054 = dma.done.wait (!%p4800_p2), %s3856_s4, 16  }
0x1d38   : > { %5056 = vsyncadd (!%p4800_p2), %s3856_s4, 4294967280  ;;  %s6046_s25 = sld [smem:[#allocation9_spill]]  ;;  %s6047_s1 = sld [smem:[#allocation7_spill]] }
0x1d39   : > { %s6048_s24 = sld [smem:[#allocation10_spill]]  ;;  %s6049_s4 = smov %s5063_s30 }
0x1d3e   : > { %p34_p3 = scmp.ge.s32.totalorder %s6046_s25, 4   ;;  %s6050_s30 = smov %s6047_s1 }
0x1d40   :  { %36 = sbr.rel (!%p34_p3) target bundleno = 14 (0xe), region = 165 }
0x1d47   :  { %3860 = vsyncpa [#allocation4], 1 }
0x1d48   :  { %3862 = vsyncpa [#allocation4 + $0x1], 1 }

</bundles_post_ra>
